<compile_context>
chip_gen: v7x
topology: tpu7x:2x2x1
jax: 0.10.0
libtpu: 0.0.40
codegen_flags: <defaults>
</compile_context>

<pallas_src>
import math
import functools

import jax
import jax.numpy as jnp
from jax.experimental import pallas as pl
from jax.experimental.pallas import tpu as pltpu

_MXU_DTYPE = jnp.bfloat16   # MXU operands in bf16, accumulate / VPU math in f32
_LN_EPS = 1e-5


# --------------------------- Fused encoder-block kernel ---------------------------

def _encoder_block_kernel(x_ref, wqkv_ref, bqkv_ref, wo_ref, bo_ref,
                          g1_ref, be1_ref, w1_ref, b1_ref, w2_ref, b2_ref,
                          g2_ref, be2_ref, o_ref, *, num_heads, scale, eps):
    """One batch element per grid step. Computes, entirely in VMEM:
         qkv = x @ wqkv + bqkv
         attn = sum_h softmax(q_h k_h^T / sqrt(dh)) @ (v_h @ wo_h)   (lane-dense)
         x1   = LayerNorm(attn + bo + x)
         out  = LayerNorm(relu(x1 @ w1 + b1) @ w2 + b2 + x1)
    """
    S = x_ref.shape[1]
    D = x_ref.shape[2]
    dh = D // num_heads

    x = x_ref[0]                                         # (S, D) f32
    xb = x.astype(_MXU_DTYPE)

    # Fused Q/K/V projection: one MXU matmul.
    qkv = jnp.dot(xb, wqkv_ref[...].astype(_MXU_DTYPE),
                  preferred_element_type=jnp.float32) + bqkv_ref[...]   # (S, 3D)

    # Multi-head self-attention with the output projection folded into the
    # head loop: each head accumulates a lane-dense (S, D) contribution.
    attn = jnp.zeros((S, D), jnp.float32)
    for h in range(num_heads):
        q = (qkv[:, h * dh:(h + 1) * dh] * scale).astype(_MXU_DTYPE)
        k = qkv[:, D + h * dh: D + (h + 1) * dh].astype(_MXU_DTYPE)
        v = qkv[:, 2 * D + h * dh: 2 * D + (h + 1) * dh].astype(_MXU_DTYPE)

        # scores = (q*scale) @ k^T  (contract head dims, no explicit transpose)
        s = jax.lax.dot_general(q, k,
                                dimension_numbers=(((1,), (1,)), ((), ())),
                                preferred_element_type=jnp.float32)      # (S, S)
        m = jnp.max(s, axis=-1, keepdims=True)
        p = jnp.exp(s - m)
        p = p * pl.reciprocal(jnp.sum(p, axis=-1, keepdims=True), approx=True)

        # Fold out-proj into the head: vo_h = v_h @ wo_h  -> (S, D)
        vo = jnp.dot(v, wo_ref[h].astype(_MXU_DTYPE),
                     preferred_element_type=jnp.float32)
        attn = attn + jnp.dot(p.astype(_MXU_DTYPE), vo.astype(_MXU_DTYPE),
                              preferred_element_type=jnp.float32)

    # Out-proj bias + residual + LayerNorm1 (dropout = identity).
    y1 = attn + bo_ref[...] + x
    mu1 = jnp.mean(y1, axis=-1, keepdims=True)
    var1 = jnp.mean((y1 - mu1) * (y1 - mu1), axis=-1, keepdims=True)
    x1 = (y1 - mu1) * jax.lax.rsqrt(var1 + eps) * g1_ref[...] + be1_ref[...]

    # FFN (single pass, weights fully resident) + residual + LayerNorm2.
    h1 = jnp.dot(x1.astype(_MXU_DTYPE), w1_ref[...].astype(_MXU_DTYPE),
                 preferred_element_type=jnp.float32) + b1_ref[...]        # (S, Dff)
    h1 = jnp.maximum(h1, 0.0)
    y2 = jnp.dot(h1.astype(_MXU_DTYPE), w2_ref[...].astype(_MXU_DTYPE),
                 preferred_element_type=jnp.float32) + b2_ref[...] + x1   # (S, D)
    mu2 = jnp.mean(y2, axis=-1, keepdims=True)
    var2 = jnp.mean((y2 - mu2) * (y2 - mu2), axis=-1, keepdims=True)
    out = (y2 - mu2) * jax.lax.rsqrt(var2 + eps) * g2_ref[...] + be2_ref[...]

    o_ref[0] = out.astype(o_ref.dtype)


def encoder_block_fused(x, p, num_heads, *, eps=_LN_EPS):
    """x: (B, S, D) f32 -> (B, S, D) f32. One pallas_call for the whole block."""
    B, S, D = x.shape
    H = num_heads
    dh = D // H
    Dff = p["w1"].shape[1]
    wo_heads = p["wo"].reshape(H, dh, D)      # per-head slices of the out-proj

    def full(shape):
        return pl.BlockSpec(shape, lambda b: (0,) * len(shape))

    kernel = functools.partial(_encoder_block_kernel, num_heads=H,
                               scale=1.0 / math.sqrt(dh), eps=eps)
    return pl.pallas_call(
        kernel,
        out_shape=jax.ShapeDtypeStruct((B, S, D), x.dtype),
        grid=(B,),
        in_specs=[
            pl.BlockSpec((1, S, D), lambda b: (b, 0, 0)),   # x
            full((D, 3 * D)),                               # wqkv
            full((1, 3 * D)),                               # bqkv
            full((H, dh, D)),                               # wo (per-head)
            full((1, D)),                                   # bo
            full((1, D)), full((1, D)),                     # ln1 gamma / beta
            full((D, Dff)), full((1, Dff)),                 # w1, b1
            full((Dff, D)), full((1, D)),                   # w2, b2
            full((1, D)), full((1, D)),                     # ln2 gamma / beta
        ],
        out_specs=pl.BlockSpec((1, S, D), lambda b: (b, 0, 0)),
        compiler_params=pltpu.CompilerParams(
            dimension_semantics=("parallel",)),
    )(x, p["wqkv"], p["bqkv"].reshape(1, 3 * D), wo_heads,
      p["bo"].reshape(1, D),
      p["ln1_g"].reshape(1, D), p["ln1_b"].reshape(1, D),
      p["w1"], p["b1"].reshape(1, Dff), p["w2"], p["b2"].reshape(1, D),
      p["ln2_g"].reshape(1, D), p["ln2_b"].reshape(1, D))


# --------------------------- Model (glue + params) ---------------------------

def sinusoidal_pe(max_len, d_model, dtype=jnp.float32):
    pos = jnp.arange(max_len, dtype=jnp.float32)[:, None]
    div = jnp.exp(jnp.arange(0, d_model, 2, dtype=jnp.float32)
                  * (-math.log(10000.0) / d_model))
    pe = jnp.zeros((max_len, d_model), dtype=jnp.float32)
    pe = pe.at[:, 0::2].set(jnp.sin(pos * div))
    pe = pe.at[:, 1::2].set(jnp.cos(pos * div))
    return pe[None].astype(dtype)             # (1, max_len, D)


def init_encoder_block(key, d, d_ff):
    ks = jax.random.split(key, 6)
    s = 0.02
    wq = jax.random.normal(ks[0], (d, d), jnp.float32) * s
    wk = jax.random.normal(ks[1], (d, d), jnp.float32) * s
    wv = jax.random.normal(ks[2], (d, d), jnp.float32) * s
    return dict(
        wqkv=jnp.concatenate([wq, wk, wv], axis=1),           # fused (d, 3d)
        bqkv=jnp.zeros((3 * d,), jnp.float32),
        wo=jax.random.normal(ks[3], (d, d), jnp.float32) * s,
        bo=jnp.zeros((d,), jnp.float32),
        ln1_g=jnp.ones((d,), jnp.float32), ln1_b=jnp.zeros((d,), jnp.float32),
        w1=jax.random.normal(ks[4], (d, d_ff), jnp.float32) * s,
        b1=jnp.zeros((d_ff,), jnp.float32),
        w2=jax.random.normal(ks[5], (d_ff, d), jnp.float32) * s,
        b2=jnp.zeros((d,), jnp.float32),
        ln2_g=jnp.ones((d,), jnp.float32), ln2_b=jnp.zeros((d,), jnp.float32),
    )


def init_tag_encoder(key, vocab_size, embed_dim, num_heads, max_len=512):
    ks = jax.random.split(key, 4)
    return dict(
        embedding=jax.random.normal(ks[0], (vocab_size, embed_dim), jnp.float32) * 0.02,
        pe=sinusoidal_pe(max_len, embed_dim),
        blocks=[init_encoder_block(ks[1 + i], embed_dim, 4 * embed_dim) for i in range(3)],
        num_heads=num_heads,
    )


def tag_encoder_forward(params, tokens, source_mask=None):
    # Embedding gather (data-dependent) + positional-encoding add kept in XLA.
    # NOTE: no sqrt(d_model) embedding scaling, matching the original module.
    B, S = tokens.shape
    x = jnp.take(params["embedding"], tokens, axis=0) + params["pe"][:, :S, :]
    # TODO(synk): source_mask handling (additive key-padding mask) not implemented.
    for blk in params["blocks"]:
        x = encoder_block_fused(x, blk, params["num_heads"])
    return x


# --------------------------- Pure-JAX f32 reference ---------------------------

def _ln_ref(y, g, b, eps=_LN_EPS):
    mu = jnp.mean(y, axis=-1, keepdims=True)
    var = jnp.mean((y - mu) ** 2, axis=-1, keepdims=True)
    return (y - mu) * jax.lax.rsqrt(var + eps) * g + b


def _encoder_block_ref(x, p, num_heads):
    B, S, D = x.shape
    H = num_heads
    dh = D // H
    qkv = x @ p["wqkv"] + p["bqkv"]
    q, k, v = jnp.split(qkv, 3, axis=-1)
    to_heads = lambda t: t.reshape(B, S, H, dh).transpose(0, 2, 1, 3)
    q, k, v = to_heads(q), to_heads(k), to_heads(v)
    s = jnp.einsum("bhqd,bhkd->bhqk", q, k) / math.sqrt(dh)
    p_attn = jax.nn.softmax(s, axis=-1)
    ctx = jnp.einsum("bhqk,bhkd->bhqd", p_attn, v)
    ctx = ctx.transpose(0, 2, 1, 3).reshape(B, S, D)
    x1 = _ln_ref(ctx @ p["wo"] + p["bo"] + x, p["ln1_g"], p["ln1_b"])
    h = jnp.maximum(x1 @ p["w1"] + p["b1"], 0.0)
    return _ln_ref(h @ p["w2"] + p["b2"] + x1, p["ln2_g"], p["ln2_b"])


def tag_encoder_reference(params, tokens):
    B, S = tokens.shape
    x = jnp.take(params["embedding"], tokens, axis=0) + params["pe"][:, :S, :]
    for blk in params["blocks"]:
        x = _encoder_block_ref(x, blk, params["num_heads"])
    return x


# --------------------------------- Demo ---------------------------------

if __name__ == "__main__":
    key = jax.random.PRNGKey(0)
    k_tok, k_par = jax.random.split(key)

    vocab_size, embed_dim, num_heads = 50, 128, 8   # D multiple of 128 (lane-dense)
    batch, seq = 2, 8                               # grid=(2,) -> both v7x TCs busy

    params = init_tag_encoder(k_par, vocab_size, embed_dim, num_heads)
    tokens = jax.random.randint(k_tok, (batch, seq), 0, vocab_size, dtype=jnp.int32)

    out = jax.block_until_ready(tag_encoder_forward(params, tokens))
    assert out.shape == (batch, seq, embed_dim)
    assert bool(jnp.all(jnp.isfinite(out)))

    # Loose tolerance: bf16 MXU operands + approx reciprocal in softmax.
    ref = jax.block_until_ready(tag_encoder_reference(params, tokens))
    max_err = float(jnp.max(jnp.abs(out - ref)))
    assert max_err < 0.1, f"max abs err {max_err}"

    print("KERNEL_OK")
</pallas_src>

<mosaic_0001>
module attributes {stable_mosaic.version = 11 : i64} {
  func.func @_encoder_block_kernel(%arg0: i32, %arg1: memref<1x8x128xf32, #tpu.memory_space<vmem>>, %arg2: memref<128x384xf32, #tpu.memory_space<vmem>>, %arg3: memref<1x384xf32, #tpu.memory_space<vmem>>, %arg4: memref<8x16x128xf32, #tpu.memory_space<vmem>>, %arg5: memref<1x128xf32, #tpu.memory_space<vmem>>, %arg6: memref<1x128xf32, #tpu.memory_space<vmem>>, %arg7: memref<1x128xf32, #tpu.memory_space<vmem>>, %arg8: memref<128x512xf32, #tpu.memory_space<vmem>>, %arg9: memref<1x512xf32, #tpu.memory_space<vmem>>, %arg10: memref<512x128xf32, #tpu.memory_space<vmem>>, %arg11: memref<1x128xf32, #tpu.memory_space<vmem>>, %arg12: memref<1x128xf32, #tpu.memory_space<vmem>>, %arg13: memref<1x128xf32, #tpu.memory_space<vmem>>, %arg14: memref<1x8x128xf32, #tpu.memory_space<vmem>>) attributes {dimension_semantics = [#tpu.dimension_semantics<parallel>], iteration_bounds = array<i64: 2>, scalar_prefetch = 0 : i64, scratch_operands = 0 : i64, tpu.core_type = #tpu.core_type<tc>, window_params = [{transform_indices = @transform_0, window_bounds = array<i64: 1, 8, 128>}, {pipeline_mode = #tpu.pipeline_mode<synchronous>, transform_indices = @transform_1, window_bounds = array<i64: 128, 384>}, {pipeline_mode = #tpu.pipeline_mode<synchronous>, transform_indices = @transform_2, window_bounds = array<i64: 1, 384>}, {pipeline_mode = #tpu.pipeline_mode<synchronous>, transform_indices = @transform_3, window_bounds = array<i64: 8, 16, 128>}, {pipeline_mode = #tpu.pipeline_mode<synchronous>, transform_indices = @transform_4, window_bounds = array<i64: 1, 128>}, {pipeline_mode = #tpu.pipeline_mode<synchronous>, transform_indices = @transform_5, window_bounds = array<i64: 1, 128>}, {pipeline_mode = #tpu.pipeline_mode<synchronous>, transform_indices = @transform_6, window_bounds = array<i64: 1, 128>}, {pipeline_mode = #tpu.pipeline_mode<synchronous>, transform_indices = @transform_7, window_bounds = array<i64: 128, 512>}, {pipeline_mode = #tpu.pipeline_mode<synchronous>, transform_indices = @transform_8, window_bounds = array<i64: 1, 512>}, {pipeline_mode = #tpu.pipeline_mode<synchronous>, transform_indices = @transform_9, window_bounds = array<i64: 512, 128>}, {pipeline_mode = #tpu.pipeline_mode<synchronous>, transform_indices = @transform_10, window_bounds = array<i64: 1, 128>}, {pipeline_mode = #tpu.pipeline_mode<synchronous>, transform_indices = @transform_11, window_bounds = array<i64: 1, 128>}, {pipeline_mode = #tpu.pipeline_mode<synchronous>, transform_indices = @transform_12, window_bounds = array<i64: 1, 128>}, {transform_indices = @transform_13, window_bounds = array<i64: 1, 8, 128>}]} {
    %c0 = arith.constant 0 : index
    %c0_0 = arith.constant 0 : index
    %c0_1 = arith.constant 0 : index
    %0 = vector.load %arg1[%c0, %c0_0, %c0_1] : memref<1x8x128xf32, #tpu.memory_space<vmem>>, vector<1x8x128xf32>
    %1 = vector.shape_cast %0 : vector<1x8x128xf32> to vector<8x128xf32>
    %2 = arith.truncf %1 : vector<8x128xf32> to vector<8x128xbf16>
    %c0_2 = arith.constant 0 : index
    %c0_3 = arith.constant 0 : index
    %3 = vector.load %arg2[%c0_2, %c0_3] : memref<128x384xf32, #tpu.memory_space<vmem>>, vector<128x384xf32>
    %4 = arith.truncf %3 : vector<128x384xf32> to vector<128x384xbf16>
    %cst = arith.constant dense<0.000000e+00> : vector<8x384xf32>
    %5 = tpu.matmul %2, %4, %cst {dimension_numbers = #tpu.dot_dimension_numbers<[1], [0], [0], [1], [0, 0, 1, 1], [], []>} : vector<8x128xbf16>, vector<128x384xbf16>, vector<8x384xf32> -> vector<8x384xf32>
    %c0_4 = arith.constant 0 : index
    %c0_5 = arith.constant 0 : index
    %6 = vector.load %arg3[%c0_4, %c0_5] : memref<1x384xf32, #tpu.memory_space<vmem>>, vector<1x384xf32>
    %7 = vector.broadcast %6 : vector<1x384xf32> to vector<8x384xf32>
    %8 = arith.addf %5, %7 : vector<8x384xf32>
    %cst_6 = arith.constant 0.000000e+00 : f32
    %9 = vector.broadcast %cst_6 : f32 to vector<8x128xf32>
    %10 = vector.extract_strided_slice %8 {offsets = [0, 0], sizes = [8, 16], strides = [1, 1]} : vector<8x384xf32> to vector<8x16xf32>
    %cst_7 = arith.constant 2.500000e-01 : f32
    %11 = vector.broadcast %cst_7 : f32 to vector<8x16xf32>
    %12 = arith.mulf %10, %11 : vector<8x16xf32>
    %13 = arith.truncf %12 : vector<8x16xf32> to vector<8x16xbf16>
    %14 = vector.extract_strided_slice %8 {offsets = [0, 128], sizes = [8, 16], strides = [1, 1]} : vector<8x384xf32> to vector<8x16xf32>
    %15 = arith.truncf %14 : vector<8x16xf32> to vector<8x16xbf16>
    %16 = vector.extract_strided_slice %8 {offsets = [0, 256], sizes = [8, 16], strides = [1, 1]} : vector<8x384xf32> to vector<8x16xf32>
    %17 = arith.truncf %16 : vector<8x16xf32> to vector<8x16xbf16>
    %cst_8 = arith.constant dense<0.000000e+00> : vector<8x8xf32>
    %18 = tpu.matmul %13, %15, %cst_8 {dimension_numbers = #tpu.dot_dimension_numbers<[1], [1], [0], [0], [0, 0, 1, 0], [], []>} : vector<8x16xbf16>, vector<8x16xbf16>, vector<8x8xf32> -> vector<8x8xf32>
    %cst_9 = arith.constant dense<0xFF800000> : vector<8xf32>
    %19 = vector.multi_reduction <maximumf>, %18, %cst_9 [1] : vector<8x8xf32> to vector<8xf32>
    %20 = vector.shape_cast %19 : vector<8xf32> to vector<8x1xf32>
    %21 = vector.broadcast %20 : vector<8x1xf32> to vector<8x8xf32>
    %22 = arith.subf %18, %21 : vector<8x8xf32>
    %23 = math.exp %22 : vector<8x8xf32>
    %cst_10 = arith.constant dense<0.000000e+00> : vector<8xf32>
    %24 = vector.multi_reduction <add>, %23, %cst_10 [1] : vector<8x8xf32> to vector<8xf32>
    %25 = vector.shape_cast %24 : vector<8xf32> to vector<8x1xf32>
    %26 = tpu.reciprocal %25 {approx = true} : vector<8x1xf32> -> vector<8x1xf32>
    %27 = vector.broadcast %26 : vector<8x1xf32> to vector<8x8xf32>
    %28 = arith.mulf %23, %27 : vector<8x8xf32>
    %c0_11 = arith.constant 0 : index
    %c0_12 = arith.constant 0 : index
    %c0_13 = arith.constant 0 : index
    %29 = vector.load %arg4[%c0_11, %c0_12, %c0_13] : memref<8x16x128xf32, #tpu.memory_space<vmem>>, vector<1x16x128xf32>
    %30 = vector.shape_cast %29 : vector<1x16x128xf32> to vector<16x128xf32>
    %31 = arith.truncf %30 : vector<16x128xf32> to vector<16x128xbf16>
    %cst_14 = arith.constant dense<0.000000e+00> : vector<8x128xf32>
    %32 = tpu.matmul %17, %31, %cst_14 {dimension_numbers = #tpu.dot_dimension_numbers<[1], [0], [0], [1], [0, 0, 1, 1], [], []>} : vector<8x16xbf16>, vector<16x128xbf16>, vector<8x128xf32> -> vector<8x128xf32>
    %33 = arith.truncf %28 : vector<8x8xf32> to vector<8x8xbf16>
    %34 = arith.truncf %32 : vector<8x128xf32> to vector<8x128xbf16>
    %cst_15 = arith.constant dense<0.000000e+00> : vector<8x128xf32>
    %35 = tpu.matmul %33, %34, %cst_15 {dimension_numbers = #tpu.dot_dimension_numbers<[1], [0], [0], [1], [0, 0, 1, 1], [], []>} : vector<8x8xbf16>, vector<8x128xbf16>, vector<8x128xf32> -> vector<8x128xf32>
    %36 = arith.addf %9, %35 : vector<8x128xf32>
    %37 = vector.extract_strided_slice %8 {offsets = [0, 16], sizes = [8, 16], strides = [1, 1]} : vector<8x384xf32> to vector<8x16xf32>
    %cst_16 = arith.constant 2.500000e-01 : f32
    %38 = vector.broadcast %cst_16 : f32 to vector<8x16xf32>
    %39 = arith.mulf %37, %38 : vector<8x16xf32>
    %40 = arith.truncf %39 : vector<8x16xf32> to vector<8x16xbf16>
    %41 = vector.extract_strided_slice %8 {offsets = [0, 144], sizes = [8, 16], strides = [1, 1]} : vector<8x384xf32> to vector<8x16xf32>
    %42 = arith.truncf %41 : vector<8x16xf32> to vector<8x16xbf16>
    %43 = vector.extract_strided_slice %8 {offsets = [0, 272], sizes = [8, 16], strides = [1, 1]} : vector<8x384xf32> to vector<8x16xf32>
    %44 = arith.truncf %43 : vector<8x16xf32> to vector<8x16xbf16>
    %cst_17 = arith.constant dense<0.000000e+00> : vector<8x8xf32>
    %45 = tpu.matmul %40, %42, %cst_17 {dimension_numbers = #tpu.dot_dimension_numbers<[1], [1], [0], [0], [0, 0, 1, 0], [], []>} : vector<8x16xbf16>, vector<8x16xbf16>, vector<8x8xf32> -> vector<8x8xf32>
    %cst_18 = arith.constant dense<0xFF800000> : vector<8xf32>
    %46 = vector.multi_reduction <maximumf>, %45, %cst_18 [1] : vector<8x8xf32> to vector<8xf32>
    %47 = vector.shape_cast %46 : vector<8xf32> to vector<8x1xf32>
    %48 = vector.broadcast %47 : vector<8x1xf32> to vector<8x8xf32>
    %49 = arith.subf %45, %48 : vector<8x8xf32>
    %50 = math.exp %49 : vector<8x8xf32>
    %cst_19 = arith.constant dense<0.000000e+00> : vector<8xf32>
    %51 = vector.multi_reduction <add>, %50, %cst_19 [1] : vector<8x8xf32> to vector<8xf32>
    %52 = vector.shape_cast %51 : vector<8xf32> to vector<8x1xf32>
    %53 = tpu.reciprocal %52 {approx = true} : vector<8x1xf32> -> vector<8x1xf32>
    %54 = vector.broadcast %53 : vector<8x1xf32> to vector<8x8xf32>
    %55 = arith.mulf %50, %54 : vector<8x8xf32>
    %c1 = arith.constant 1 : index
    %c0_20 = arith.constant 0 : index
    %c0_21 = arith.constant 0 : index
    %56 = vector.load %arg4[%c1, %c0_20, %c0_21] : memref<8x16x128xf32, #tpu.memory_space<vmem>>, vector<1x16x128xf32>
    %57 = vector.shape_cast %56 : vector<1x16x128xf32> to vector<16x128xf32>
    %58 = arith.truncf %57 : vector<16x128xf32> to vector<16x128xbf16>
    %cst_22 = arith.constant dense<0.000000e+00> : vector<8x128xf32>
    %59 = tpu.matmul %44, %58, %cst_22 {dimension_numbers = #tpu.dot_dimension_numbers<[1], [0], [0], [1], [0, 0, 1, 1], [], []>} : vector<8x16xbf16>, vector<16x128xbf16>, vector<8x128xf32> -> vector<8x128xf32>
    %60 = arith.truncf %55 : vector<8x8xf32> to vector<8x8xbf16>
    %61 = arith.truncf %59 : vector<8x128xf32> to vector<8x128xbf16>
    %cst_23 = arith.constant dense<0.000000e+00> : vector<8x128xf32>
    %62 = tpu.matmul %60, %61, %cst_23 {dimension_numbers = #tpu.dot_dimension_numbers<[1], [0], [0], [1], [0, 0, 1, 1], [], []>} : vector<8x8xbf16>, vector<8x128xbf16>, vector<8x128xf32> -> vector<8x128xf32>
    %63 = arith.addf %36, %62 : vector<8x128xf32>
    %64 = vector.extract_strided_slice %8 {offsets = [0, 32], sizes = [8, 16], strides = [1, 1]} : vector<8x384xf32> to vector<8x16xf32>
    %cst_24 = arith.constant 2.500000e-01 : f32
    %65 = vector.broadcast %cst_24 : f32 to vector<8x16xf32>
    %66 = arith.mulf %64, %65 : vector<8x16xf32>
    %67 = arith.truncf %66 : vector<8x16xf32> to vector<8x16xbf16>
    %68 = vector.extract_strided_slice %8 {offsets = [0, 160], sizes = [8, 16], strides = [1, 1]} : vector<8x384xf32> to vector<8x16xf32>
    %69 = arith.truncf %68 : vector<8x16xf32> to vector<8x16xbf16>
    %70 = vector.extract_strided_slice %8 {offsets = [0, 288], sizes = [8, 16], strides = [1, 1]} : vector<8x384xf32> to vector<8x16xf32>
    %71 = arith.truncf %70 : vector<8x16xf32> to vector<8x16xbf16>
    %cst_25 = arith.constant dense<0.000000e+00> : vector<8x8xf32>
    %72 = tpu.matmul %67, %69, %cst_25 {dimension_numbers = #tpu.dot_dimension_numbers<[1], [1], [0], [0], [0, 0, 1, 0], [], []>} : vector<8x16xbf16>, vector<8x16xbf16>, vector<8x8xf32> -> vector<8x8xf32>
    %cst_26 = arith.constant dense<0xFF800000> : vector<8xf32>
    %73 = vector.multi_reduction <maximumf>, %72, %cst_26 [1] : vector<8x8xf32> to vector<8xf32>
    %74 = vector.shape_cast %73 : vector<8xf32> to vector<8x1xf32>
    %75 = vector.broadcast %74 : vector<8x1xf32> to vector<8x8xf32>
    %76 = arith.subf %72, %75 : vector<8x8xf32>
    %77 = math.exp %76 : vector<8x8xf32>
    %cst_27 = arith.constant dense<0.000000e+00> : vector<8xf32>
    %78 = vector.multi_reduction <add>, %77, %cst_27 [1] : vector<8x8xf32> to vector<8xf32>
    %79 = vector.shape_cast %78 : vector<8xf32> to vector<8x1xf32>
    %80 = tpu.reciprocal %79 {approx = true} : vector<8x1xf32> -> vector<8x1xf32>
    %81 = vector.broadcast %80 : vector<8x1xf32> to vector<8x8xf32>
    %82 = arith.mulf %77, %81 : vector<8x8xf32>
    %c2 = arith.constant 2 : index
    %c0_28 = arith.constant 0 : index
    %c0_29 = arith.constant 0 : index
    %83 = vector.load %arg4[%c2, %c0_28, %c0_29] : memref<8x16x128xf32, #tpu.memory_space<vmem>>, vector<1x16x128xf32>
    %84 = vector.shape_cast %83 : vector<1x16x128xf32> to vector<16x128xf32>
    %85 = arith.truncf %84 : vector<16x128xf32> to vector<16x128xbf16>
    %cst_30 = arith.constant dense<0.000000e+00> : vector<8x128xf32>
    %86 = tpu.matmul %71, %85, %cst_30 {dimension_numbers = #tpu.dot_dimension_numbers<[1], [0], [0], [1], [0, 0, 1, 1], [], []>} : vector<8x16xbf16>, vector<16x128xbf16>, vector<8x128xf32> -> vector<8x128xf32>
    %87 = arith.truncf %82 : vector<8x8xf32> to vector<8x8xbf16>
    %88 = arith.truncf %86 : vector<8x128xf32> to vector<8x128xbf16>
    %cst_31 = arith.constant dense<0.000000e+00> : vector<8x128xf32>
    %89 = tpu.matmul %87, %88, %cst_31 {dimension_numbers = #tpu.dot_dimension_numbers<[1], [0], [0], [1], [0, 0, 1, 1], [], []>} : vector<8x8xbf16>, vector<8x128xbf16>, vector<8x128xf32> -> vector<8x128xf32>
    %90 = arith.addf %63, %89 : vector<8x128xf32>
    %91 = vector.extract_strided_slice %8 {offsets = [0, 48], sizes = [8, 16], strides = [1, 1]} : vector<8x384xf32> to vector<8x16xf32>
    %cst_32 = arith.constant 2.500000e-01 : f32
    %92 = vector.broadcast %cst_32 : f32 to vector<8x16xf32>
    %93 = arith.mulf %91, %92 : vector<8x16xf32>
    %94 = arith.truncf %93 : vector<8x16xf32> to vector<8x16xbf16>
    %95 = vector.extract_strided_slice %8 {offsets = [0, 176], sizes = [8, 16], strides = [1, 1]} : vector<8x384xf32> to vector<8x16xf32>
    %96 = arith.truncf %95 : vector<8x16xf32> to vector<8x16xbf16>
    %97 = vector.extract_strided_slice %8 {offsets = [0, 304], sizes = [8, 16], strides = [1, 1]} : vector<8x384xf32> to vector<8x16xf32>
    %98 = arith.truncf %97 : vector<8x16xf32> to vector<8x16xbf16>
    %cst_33 = arith.constant dense<0.000000e+00> : vector<8x8xf32>
    %99 = tpu.matmul %94, %96, %cst_33 {dimension_numbers = #tpu.dot_dimension_numbers<[1], [1], [0], [0], [0, 0, 1, 0], [], []>} : vector<8x16xbf16>, vector<8x16xbf16>, vector<8x8xf32> -> vector<8x8xf32>
    %cst_34 = arith.constant dense<0xFF800000> : vector<8xf32>
    %100 = vector.multi_reduction <maximumf>, %99, %cst_34 [1] : vector<8x8xf32> to vector<8xf32>
    %101 = vector.shape_cast %100 : vector<8xf32> to vector<8x1xf32>
    %102 = vector.broadcast %101 : vector<8x1xf32> to vector<8x8xf32>
    %103 = arith.subf %99, %102 : vector<8x8xf32>
    %104 = math.exp %103 : vector<8x8xf32>
    %cst_35 = arith.constant dense<0.000000e+00> : vector<8xf32>
    %105 = vector.multi_reduction <add>, %104, %cst_35 [1] : vector<8x8xf32> to vector<8xf32>
    %106 = vector.shape_cast %105 : vector<8xf32> to vector<8x1xf32>
    %107 = tpu.reciprocal %106 {approx = true} : vector<8x1xf32> -> vector<8x1xf32>
    %108 = vector.broadcast %107 : vector<8x1xf32> to vector<8x8xf32>
    %109 = arith.mulf %104, %108 : vector<8x8xf32>
    %c3 = arith.constant 3 : index
    %c0_36 = arith.constant 0 : index
    %c0_37 = arith.constant 0 : index
    %110 = vector.load %arg4[%c3, %c0_36, %c0_37] : memref<8x16x128xf32, #tpu.memory_space<vmem>>, vector<1x16x128xf32>
    %111 = vector.shape_cast %110 : vector<1x16x128xf32> to vector<16x128xf32>
    %112 = arith.truncf %111 : vector<16x128xf32> to vector<16x128xbf16>
    %cst_38 = arith.constant dense<0.000000e+00> : vector<8x128xf32>
    %113 = tpu.matmul %98, %112, %cst_38 {dimension_numbers = #tpu.dot_dimension_numbers<[1], [0], [0], [1], [0, 0, 1, 1], [], []>} : vector<8x16xbf16>, vector<16x128xbf16>, vector<8x128xf32> -> vector<8x128xf32>
    %114 = arith.truncf %109 : vector<8x8xf32> to vector<8x8xbf16>
    %115 = arith.truncf %113 : vector<8x128xf32> to vector<8x128xbf16>
    %cst_39 = arith.constant dense<0.000000e+00> : vector<8x128xf32>
    %116 = tpu.matmul %114, %115, %cst_39 {dimension_numbers = #tpu.dot_dimension_numbers<[1], [0], [0], [1], [0, 0, 1, 1], [], []>} : vector<8x8xbf16>, vector<8x128xbf16>, vector<8x128xf32> -> vector<8x128xf32>
    %117 = arith.addf %90, %116 : vector<8x128xf32>
    %118 = vector.extract_strided_slice %8 {offsets = [0, 64], sizes = [8, 16], strides = [1, 1]} : vector<8x384xf32> to vector<8x16xf32>
    %cst_40 = arith.constant 2.500000e-01 : f32
    %119 = vector.broadcast %cst_40 : f32 to vector<8x16xf32>
    %120 = arith.mulf %118, %119 : vector<8x16xf32>
    %121 = arith.truncf %120 : vector<8x16xf32> to vector<8x16xbf16>
    %122 = vector.extract_strided_slice %8 {offsets = [0, 192], sizes = [8, 16], strides = [1, 1]} : vector<8x384xf32> to vector<8x16xf32>
    %123 = arith.truncf %122 : vector<8x16xf32> to vector<8x16xbf16>
    %124 = vector.extract_strided_slice %8 {offsets = [0, 320], sizes = [8, 16], strides = [1, 1]} : vector<8x384xf32> to vector<8x16xf32>
    %125 = arith.truncf %124 : vector<8x16xf32> to vector<8x16xbf16>
    %cst_41 = arith.constant dense<0.000000e+00> : vector<8x8xf32>
    %126 = tpu.matmul %121, %123, %cst_41 {dimension_numbers = #tpu.dot_dimension_numbers<[1], [1], [0], [0], [0, 0, 1, 0], [], []>} : vector<8x16xbf16>, vector<8x16xbf16>, vector<8x8xf32> -> vector<8x8xf32>
    %cst_42 = arith.constant dense<0xFF800000> : vector<8xf32>
    %127 = vector.multi_reduction <maximumf>, %126, %cst_42 [1] : vector<8x8xf32> to vector<8xf32>
    %128 = vector.shape_cast %127 : vector<8xf32> to vector<8x1xf32>
    %129 = vector.broadcast %128 : vector<8x1xf32> to vector<8x8xf32>
    %130 = arith.subf %126, %129 : vector<8x8xf32>
    %131 = math.exp %130 : vector<8x8xf32>
    %cst_43 = arith.constant dense<0.000000e+00> : vector<8xf32>
    %132 = vector.multi_reduction <add>, %131, %cst_43 [1] : vector<8x8xf32> to vector<8xf32>
    %133 = vector.shape_cast %132 : vector<8xf32> to vector<8x1xf32>
    %134 = tpu.reciprocal %133 {approx = true} : vector<8x1xf32> -> vector<8x1xf32>
    %135 = vector.broadcast %134 : vector<8x1xf32> to vector<8x8xf32>
    %136 = arith.mulf %131, %135 : vector<8x8xf32>
    %c4 = arith.constant 4 : index
    %c0_44 = arith.constant 0 : index
    %c0_45 = arith.constant 0 : index
    %137 = vector.load %arg4[%c4, %c0_44, %c0_45] : memref<8x16x128xf32, #tpu.memory_space<vmem>>, vector<1x16x128xf32>
    %138 = vector.shape_cast %137 : vector<1x16x128xf32> to vector<16x128xf32>
    %139 = arith.truncf %138 : vector<16x128xf32> to vector<16x128xbf16>
    %cst_46 = arith.constant dense<0.000000e+00> : vector<8x128xf32>
    %140 = tpu.matmul %125, %139, %cst_46 {dimension_numbers = #tpu.dot_dimension_numbers<[1], [0], [0], [1], [0, 0, 1, 1], [], []>} : vector<8x16xbf16>, vector<16x128xbf16>, vector<8x128xf32> -> vector<8x128xf32>
    %141 = arith.truncf %136 : vector<8x8xf32> to vector<8x8xbf16>
    %142 = arith.truncf %140 : vector<8x128xf32> to vector<8x128xbf16>
    %cst_47 = arith.constant dense<0.000000e+00> : vector<8x128xf32>
    %143 = tpu.matmul %141, %142, %cst_47 {dimension_numbers = #tpu.dot_dimension_numbers<[1], [0], [0], [1], [0, 0, 1, 1], [], []>} : vector<8x8xbf16>, vector<8x128xbf16>, vector<8x128xf32> -> vector<8x128xf32>
    %144 = arith.addf %117, %143 : vector<8x128xf32>
    %145 = vector.extract_strided_slice %8 {offsets = [0, 80], sizes = [8, 16], strides = [1, 1]} : vector<8x384xf32> to vector<8x16xf32>
    %cst_48 = arith.constant 2.500000e-01 : f32
    %146 = vector.broadcast %cst_48 : f32 to vector<8x16xf32>
    %147 = arith.mulf %145, %146 : vector<8x16xf32>
    %148 = arith.truncf %147 : vector<8x16xf32> to vector<8x16xbf16>
    %149 = vector.extract_strided_slice %8 {offsets = [0, 208], sizes = [8, 16], strides = [1, 1]} : vector<8x384xf32> to vector<8x16xf32>
    %150 = arith.truncf %149 : vector<8x16xf32> to vector<8x16xbf16>
    %151 = vector.extract_strided_slice %8 {offsets = [0, 336], sizes = [8, 16], strides = [1, 1]} : vector<8x384xf32> to vector<8x16xf32>
    %152 = arith.truncf %151 : vector<8x16xf32> to vector<8x16xbf16>
    %cst_49 = arith.constant dense<0.000000e+00> : vector<8x8xf32>
    %153 = tpu.matmul %148, %150, %cst_49 {dimension_numbers = #tpu.dot_dimension_numbers<[1], [1], [0], [0], [0, 0, 1, 0], [], []>} : vector<8x16xbf16>, vector<8x16xbf16>, vector<8x8xf32> -> vector<8x8xf32>
    %cst_50 = arith.constant dense<0xFF800000> : vector<8xf32>
    %154 = vector.multi_reduction <maximumf>, %153, %cst_50 [1] : vector<8x8xf32> to vector<8xf32>
    %155 = vector.shape_cast %154 : vector<8xf32> to vector<8x1xf32>
    %156 = vector.broadcast %155 : vector<8x1xf32> to vector<8x8xf32>
    %157 = arith.subf %153, %156 : vector<8x8xf32>
    %158 = math.exp %157 : vector<8x8xf32>
    %cst_51 = arith.constant dense<0.000000e+00> : vector<8xf32>
    %159 = vector.multi_reduction <add>, %158, %cst_51 [1] : vector<8x8xf32> to vector<8xf32>
    %160 = vector.shape_cast %159 : vector<8xf32> to vector<8x1xf32>
    %161 = tpu.reciprocal %160 {approx = true} : vector<8x1xf32> -> vector<8x1xf32>
    %162 = vector.broadcast %161 : vector<8x1xf32> to vector<8x8xf32>
    %163 = arith.mulf %158, %162 : vector<8x8xf32>
    %c5 = arith.constant 5 : index
    %c0_52 = arith.constant 0 : index
    %c0_53 = arith.constant 0 : index
    %164 = vector.load %arg4[%c5, %c0_52, %c0_53] : memref<8x16x128xf32, #tpu.memory_space<vmem>>, vector<1x16x128xf32>
    %165 = vector.shape_cast %164 : vector<1x16x128xf32> to vector<16x128xf32>
    %166 = arith.truncf %165 : vector<16x128xf32> to vector<16x128xbf16>
    %cst_54 = arith.constant dense<0.000000e+00> : vector<8x128xf32>
    %167 = tpu.matmul %152, %166, %cst_54 {dimension_numbers = #tpu.dot_dimension_numbers<[1], [0], [0], [1], [0, 0, 1, 1], [], []>} : vector<8x16xbf16>, vector<16x128xbf16>, vector<8x128xf32> -> vector<8x128xf32>
    %168 = arith.truncf %163 : vector<8x8xf32> to vector<8x8xbf16>
    %169 = arith.truncf %167 : vector<8x128xf32> to vector<8x128xbf16>
    %cst_55 = arith.constant dense<0.000000e+00> : vector<8x128xf32>
    %170 = tpu.matmul %168, %169, %cst_55 {dimension_numbers = #tpu.dot_dimension_numbers<[1], [0], [0], [1], [0, 0, 1, 1], [], []>} : vector<8x8xbf16>, vector<8x128xbf16>, vector<8x128xf32> -> vector<8x128xf32>
    %171 = arith.addf %144, %170 : vector<8x128xf32>
    %172 = vector.extract_strided_slice %8 {offsets = [0, 96], sizes = [8, 16], strides = [1, 1]} : vector<8x384xf32> to vector<8x16xf32>
    %cst_56 = arith.constant 2.500000e-01 : f32
    %173 = vector.broadcast %cst_56 : f32 to vector<8x16xf32>
    %174 = arith.mulf %172, %173 : vector<8x16xf32>
    %175 = arith.truncf %174 : vector<8x16xf32> to vector<8x16xbf16>
    %176 = vector.extract_strided_slice %8 {offsets = [0, 224], sizes = [8, 16], strides = [1, 1]} : vector<8x384xf32> to vector<8x16xf32>
    %177 = arith.truncf %176 : vector<8x16xf32> to vector<8x16xbf16>
    %178 = vector.extract_strided_slice %8 {offsets = [0, 352], sizes = [8, 16], strides = [1, 1]} : vector<8x384xf32> to vector<8x16xf32>
    %179 = arith.truncf %178 : vector<8x16xf32> to vector<8x16xbf16>
    %cst_57 = arith.constant dense<0.000000e+00> : vector<8x8xf32>
    %180 = tpu.matmul %175, %177, %cst_57 {dimension_numbers = #tpu.dot_dimension_numbers<[1], [1], [0], [0], [0, 0, 1, 0], [], []>} : vector<8x16xbf16>, vector<8x16xbf16>, vector<8x8xf32> -> vector<8x8xf32>
    %cst_58 = arith.constant dense<0xFF800000> : vector<8xf32>
    %181 = vector.multi_reduction <maximumf>, %180, %cst_58 [1] : vector<8x8xf32> to vector<8xf32>
    %182 = vector.shape_cast %181 : vector<8xf32> to vector<8x1xf32>
    %183 = vector.broadcast %182 : vector<8x1xf32> to vector<8x8xf32>
    %184 = arith.subf %180, %183 : vector<8x8xf32>
    %185 = math.exp %184 : vector<8x8xf32>
    %cst_59 = arith.constant dense<0.000000e+00> : vector<8xf32>
    %186 = vector.multi_reduction <add>, %185, %cst_59 [1] : vector<8x8xf32> to vector<8xf32>
    %187 = vector.shape_cast %186 : vector<8xf32> to vector<8x1xf32>
    %188 = tpu.reciprocal %187 {approx = true} : vector<8x1xf32> -> vector<8x1xf32>
    %189 = vector.broadcast %188 : vector<8x1xf32> to vector<8x8xf32>
    %190 = arith.mulf %185, %189 : vector<8x8xf32>
    %c6 = arith.constant 6 : index
    %c0_60 = arith.constant 0 : index
    %c0_61 = arith.constant 0 : index
    %191 = vector.load %arg4[%c6, %c0_60, %c0_61] : memref<8x16x128xf32, #tpu.memory_space<vmem>>, vector<1x16x128xf32>
    %192 = vector.shape_cast %191 : vector<1x16x128xf32> to vector<16x128xf32>
    %193 = arith.truncf %192 : vector<16x128xf32> to vector<16x128xbf16>
    %cst_62 = arith.constant dense<0.000000e+00> : vector<8x128xf32>
    %194 = tpu.matmul %179, %193, %cst_62 {dimension_numbers = #tpu.dot_dimension_numbers<[1], [0], [0], [1], [0, 0, 1, 1], [], []>} : vector<8x16xbf16>, vector<16x128xbf16>, vector<8x128xf32> -> vector<8x128xf32>
    %195 = arith.truncf %190 : vector<8x8xf32> to vector<8x8xbf16>
    %196 = arith.truncf %194 : vector<8x128xf32> to vector<8x128xbf16>
    %cst_63 = arith.constant dense<0.000000e+00> : vector<8x128xf32>
    %197 = tpu.matmul %195, %196, %cst_63 {dimension_numbers = #tpu.dot_dimension_numbers<[1], [0], [0], [1], [0, 0, 1, 1], [], []>} : vector<8x8xbf16>, vector<8x128xbf16>, vector<8x128xf32> -> vector<8x128xf32>
    %198 = arith.addf %171, %197 : vector<8x128xf32>
    %199 = vector.extract_strided_slice %8 {offsets = [0, 112], sizes = [8, 16], strides = [1, 1]} : vector<8x384xf32> to vector<8x16xf32>
    %cst_64 = arith.constant 2.500000e-01 : f32
    %200 = vector.broadcast %cst_64 : f32 to vector<8x16xf32>
    %201 = arith.mulf %199, %200 : vector<8x16xf32>
    %202 = arith.truncf %201 : vector<8x16xf32> to vector<8x16xbf16>
    %203 = vector.extract_strided_slice %8 {offsets = [0, 240], sizes = [8, 16], strides = [1, 1]} : vector<8x384xf32> to vector<8x16xf32>
    %204 = arith.truncf %203 : vector<8x16xf32> to vector<8x16xbf16>
    %205 = vector.extract_strided_slice %8 {offsets = [0, 368], sizes = [8, 16], strides = [1, 1]} : vector<8x384xf32> to vector<8x16xf32>
    %206 = arith.truncf %205 : vector<8x16xf32> to vector<8x16xbf16>
    %cst_65 = arith.constant dense<0.000000e+00> : vector<8x8xf32>
    %207 = tpu.matmul %202, %204, %cst_65 {dimension_numbers = #tpu.dot_dimension_numbers<[1], [1], [0], [0], [0, 0, 1, 0], [], []>} : vector<8x16xbf16>, vector<8x16xbf16>, vector<8x8xf32> -> vector<8x8xf32>
    %cst_66 = arith.constant dense<0xFF800000> : vector<8xf32>
    %208 = vector.multi_reduction <maximumf>, %207, %cst_66 [1] : vector<8x8xf32> to vector<8xf32>
    %209 = vector.shape_cast %208 : vector<8xf32> to vector<8x1xf32>
    %210 = vector.broadcast %209 : vector<8x1xf32> to vector<8x8xf32>
    %211 = arith.subf %207, %210 : vector<8x8xf32>
    %212 = math.exp %211 : vector<8x8xf32>
    %cst_67 = arith.constant dense<0.000000e+00> : vector<8xf32>
    %213 = vector.multi_reduction <add>, %212, %cst_67 [1] : vector<8x8xf32> to vector<8xf32>
    %214 = vector.shape_cast %213 : vector<8xf32> to vector<8x1xf32>
    %215 = tpu.reciprocal %214 {approx = true} : vector<8x1xf32> -> vector<8x1xf32>
    %216 = vector.broadcast %215 : vector<8x1xf32> to vector<8x8xf32>
    %217 = arith.mulf %212, %216 : vector<8x8xf32>
    %c7 = arith.constant 7 : index
    %c0_68 = arith.constant 0 : index
    %c0_69 = arith.constant 0 : index
    %218 = vector.load %arg4[%c7, %c0_68, %c0_69] : memref<8x16x128xf32, #tpu.memory_space<vmem>>, vector<1x16x128xf32>
    %219 = vector.shape_cast %218 : vector<1x16x128xf32> to vector<16x128xf32>
    %220 = arith.truncf %219 : vector<16x128xf32> to vector<16x128xbf16>
    %cst_70 = arith.constant dense<0.000000e+00> : vector<8x128xf32>
    %221 = tpu.matmul %206, %220, %cst_70 {dimension_numbers = #tpu.dot_dimension_numbers<[1], [0], [0], [1], [0, 0, 1, 1], [], []>} : vector<8x16xbf16>, vector<16x128xbf16>, vector<8x128xf32> -> vector<8x128xf32>
    %222 = arith.truncf %217 : vector<8x8xf32> to vector<8x8xbf16>
    %223 = arith.truncf %221 : vector<8x128xf32> to vector<8x128xbf16>
    %cst_71 = arith.constant dense<0.000000e+00> : vector<8x128xf32>
    %224 = tpu.matmul %222, %223, %cst_71 {dimension_numbers = #tpu.dot_dimension_numbers<[1], [0], [0], [1], [0, 0, 1, 1], [], []>} : vector<8x8xbf16>, vector<8x128xbf16>, vector<8x128xf32> -> vector<8x128xf32>
    %225 = arith.addf %198, %224 : vector<8x128xf32>
    %c0_72 = arith.constant 0 : index
    %c0_73 = arith.constant 0 : index
    %226 = vector.load %arg5[%c0_72, %c0_73] : memref<1x128xf32, #tpu.memory_space<vmem>>, vector<1x128xf32>
    %227 = vector.broadcast %226 : vector<1x128xf32> to vector<8x128xf32>
    %228 = arith.addf %225, %227 : vector<8x128xf32>
    %229 = arith.addf %228, %1 : vector<8x128xf32>
    %cst_74 = arith.constant dense<0.000000e+00> : vector<8xf32>
    %230 = vector.multi_reduction <add>, %229, %cst_74 [1] : vector<8x128xf32> to vector<8xf32>
    %231 = vector.shape_cast %230 : vector<8xf32> to vector<8x1xf32>
    %cst_75 = arith.constant 1.280000e+02 : f32
    %232 = vector.broadcast %cst_75 : f32 to vector<8x1xf32>
    %233 = arith.divf %231, %232 : vector<8x1xf32>
    %234 = vector.broadcast %233 : vector<8x1xf32> to vector<8x128xf32>
    %235 = arith.subf %229, %234 : vector<8x128xf32>
    %236 = vector.broadcast %233 : vector<8x1xf32> to vector<8x128xf32>
    %237 = arith.subf %229, %236 : vector<8x128xf32>
    %238 = arith.mulf %235, %237 : vector<8x128xf32>
    %cst_76 = arith.constant dense<0.000000e+00> : vector<8xf32>
    %239 = vector.multi_reduction <add>, %238, %cst_76 [1] : vector<8x128xf32> to vector<8xf32>
    %240 = vector.shape_cast %239 : vector<8xf32> to vector<8x1xf32>
    %cst_77 = arith.constant 1.280000e+02 : f32
    %241 = vector.broadcast %cst_77 : f32 to vector<8x1xf32>
    %242 = arith.divf %240, %241 : vector<8x1xf32>
    %243 = vector.broadcast %233 : vector<8x1xf32> to vector<8x128xf32>
    %244 = arith.subf %229, %243 : vector<8x128xf32>
    %cst_78 = arith.constant 9.99999974E-6 : f32
    %245 = vector.broadcast %cst_78 : f32 to vector<8x1xf32>
    %246 = arith.addf %242, %245 : vector<8x1xf32>
    %247 = math.rsqrt %246 : vector<8x1xf32>
    %248 = vector.broadcast %247 : vector<8x1xf32> to vector<8x128xf32>
    %249 = arith.mulf %244, %248 : vector<8x128xf32>
    %c0_79 = arith.constant 0 : index
    %c0_80 = arith.constant 0 : index
    %250 = vector.load %arg6[%c0_79, %c0_80] : memref<1x128xf32, #tpu.memory_space<vmem>>, vector<1x128xf32>
    %251 = vector.broadcast %250 : vector<1x128xf32> to vector<8x128xf32>
    %252 = arith.mulf %249, %251 : vector<8x128xf32>
    %c0_81 = arith.constant 0 : index
    %c0_82 = arith.constant 0 : index
    %253 = vector.load %arg7[%c0_81, %c0_82] : memref<1x128xf32, #tpu.memory_space<vmem>>, vector<1x128xf32>
    %254 = vector.broadcast %253 : vector<1x128xf32> to vector<8x128xf32>
    %255 = arith.addf %252, %254 : vector<8x128xf32>
    %256 = arith.truncf %255 : vector<8x128xf32> to vector<8x128xbf16>
    %c0_83 = arith.constant 0 : index
    %c0_84 = arith.constant 0 : index
    %257 = vector.load %arg8[%c0_83, %c0_84] : memref<128x512xf32, #tpu.memory_space<vmem>>, vector<128x512xf32>
    %258 = arith.truncf %257 : vector<128x512xf32> to vector<128x512xbf16>
    %cst_85 = arith.constant dense<0.000000e+00> : vector<8x512xf32>
    %259 = tpu.matmul %256, %258, %cst_85 {dimension_numbers = #tpu.dot_dimension_numbers<[1], [0], [0], [1], [0, 0, 1, 1], [], []>} : vector<8x128xbf16>, vector<128x512xbf16>, vector<8x512xf32> -> vector<8x512xf32>
    %c0_86 = arith.constant 0 : index
    %c0_87 = arith.constant 0 : index
    %260 = vector.load %arg9[%c0_86, %c0_87] : memref<1x512xf32, #tpu.memory_space<vmem>>, vector<1x512xf32>
    %261 = vector.broadcast %260 : vector<1x512xf32> to vector<8x512xf32>
    %262 = arith.addf %259, %261 : vector<8x512xf32>
    %cst_88 = arith.constant 0.000000e+00 : f32
    %263 = vector.broadcast %cst_88 : f32 to vector<8x512xf32>
    %264 = arith.maximumf %262, %263 : vector<8x512xf32>
    %265 = arith.truncf %264 : vector<8x512xf32> to vector<8x512xbf16>
    %c0_89 = arith.constant 0 : index
    %c0_90 = arith.constant 0 : index
    %266 = vector.load %arg10[%c0_89, %c0_90] : memref<512x128xf32, #tpu.memory_space<vmem>>, vector<512x128xf32>
    %267 = arith.truncf %266 : vector<512x128xf32> to vector<512x128xbf16>
    %cst_91 = arith.constant dense<0.000000e+00> : vector<8x128xf32>
    %268 = tpu.matmul %265, %267, %cst_91 {dimension_numbers = #tpu.dot_dimension_numbers<[1], [0], [0], [1], [0, 0, 1, 1], [], []>} : vector<8x512xbf16>, vector<512x128xbf16>, vector<8x128xf32> -> vector<8x128xf32>
    %c0_92 = arith.constant 0 : index
    %c0_93 = arith.constant 0 : index
    %269 = vector.load %arg11[%c0_92, %c0_93] : memref<1x128xf32, #tpu.memory_space<vmem>>, vector<1x128xf32>
    %270 = vector.broadcast %269 : vector<1x128xf32> to vector<8x128xf32>
    %271 = arith.addf %268, %270 : vector<8x128xf32>
    %272 = arith.addf %271, %255 : vector<8x128xf32>
    %cst_94 = arith.constant dense<0.000000e+00> : vector<8xf32>
    %273 = vector.multi_reduction <add>, %272, %cst_94 [1] : vector<8x128xf32> to vector<8xf32>
    %274 = vector.shape_cast %273 : vector<8xf32> to vector<8x1xf32>
    %cst_95 = arith.constant 1.280000e+02 : f32
    %275 = vector.broadcast %cst_95 : f32 to vector<8x1xf32>
    %276 = arith.divf %274, %275 : vector<8x1xf32>
    %277 = vector.broadcast %276 : vector<8x1xf32> to vector<8x128xf32>
    %278 = arith.subf %272, %277 : vector<8x128xf32>
    %279 = vector.broadcast %276 : vector<8x1xf32> to vector<8x128xf32>
    %280 = arith.subf %272, %279 : vector<8x128xf32>
    %281 = arith.mulf %278, %280 : vector<8x128xf32>
    %cst_96 = arith.constant dense<0.000000e+00> : vector<8xf32>
    %282 = vector.multi_reduction <add>, %281, %cst_96 [1] : vector<8x128xf32> to vector<8xf32>
    %283 = vector.shape_cast %282 : vector<8xf32> to vector<8x1xf32>
    %cst_97 = arith.constant 1.280000e+02 : f32
    %284 = vector.broadcast %cst_97 : f32 to vector<8x1xf32>
    %285 = arith.divf %283, %284 : vector<8x1xf32>
    %286 = vector.broadcast %276 : vector<8x1xf32> to vector<8x128xf32>
    %287 = arith.subf %272, %286 : vector<8x128xf32>
    %cst_98 = arith.constant 9.99999974E-6 : f32
    %288 = vector.broadcast %cst_98 : f32 to vector<8x1xf32>
    %289 = arith.addf %285, %288 : vector<8x1xf32>
    %290 = math.rsqrt %289 : vector<8x1xf32>
    %291 = vector.broadcast %290 : vector<8x1xf32> to vector<8x128xf32>
    %292 = arith.mulf %287, %291 : vector<8x128xf32>
    %c0_99 = arith.constant 0 : index
    %c0_100 = arith.constant 0 : index
    %293 = vector.load %arg12[%c0_99, %c0_100] : memref<1x128xf32, #tpu.memory_space<vmem>>, vector<1x128xf32>
    %294 = vector.broadcast %293 : vector<1x128xf32> to vector<8x128xf32>
    %295 = arith.mulf %292, %294 : vector<8x128xf32>
    %c0_101 = arith.constant 0 : index
    %c0_102 = arith.constant 0 : index
    %296 = vector.load %arg13[%c0_101, %c0_102] : memref<1x128xf32, #tpu.memory_space<vmem>>, vector<1x128xf32>
    %297 = vector.broadcast %296 : vector<1x128xf32> to vector<8x128xf32>
    %298 = arith.addf %295, %297 : vector<8x128xf32>
    %c0_103 = arith.constant 0 : index
    %c0_104 = arith.constant 0 : index
    %c0_105 = arith.constant 0 : index
    %299 = vector.load %arg14[%c0_103, %c0_104, %c0_105] : memref<1x8x128xf32, #tpu.memory_space<vmem>>, vector<1x8x128xf32>
    %300 = vector.shape_cast %299 : vector<1x8x128xf32> to vector<8x128xf32>
    %301 = vector.shape_cast %298 : vector<8x128xf32> to vector<1x8x128xf32>
    tpu.vector_store %arg14[%c0_103, %c0_104, %c0_105], %301 {strides = array<i32>} : memref<1x8x128xf32, #tpu.memory_space<vmem>>, vector<1x8x128xf32>,
    return
  }
  func.func @transform_0(%arg0: i32) -> (i32, i32, i32) {
    %c0_i32 = arith.constant 0 : i32
    %c0_i32_0 = arith.constant 0 : i32
    %c0_i32_1 = arith.constant 0 : i32
    return %arg0, %c0_i32, %c0_i32_0 : i32, i32, i32
  }
  func.func @transform_1(%arg0: i32) -> (i32, i32) {
    %c0_i32 = arith.constant 0 : i32
    %c0_i32_0 = arith.constant 0 : i32
    %c0_i32_1 = arith.constant 0 : i32
    return %c0_i32, %c0_i32_0 : i32, i32
  }
  func.func @transform_2(%arg0: i32) -> (i32, i32) {
    %c0_i32 = arith.constant 0 : i32
    %c0_i32_0 = arith.constant 0 : i32
    %c0_i32_1 = arith.constant 0 : i32
    return %c0_i32, %c0_i32_0 : i32, i32
  }
  func.func @transform_3(%arg0: i32) -> (i32, i32, i32) {
    %c0_i32 = arith.constant 0 : i32
    %c0_i32_0 = arith.constant 0 : i32
    %c0_i32_1 = arith.constant 0 : i32
    %c0_i32_2 = arith.constant 0 : i32
    return %c0_i32, %c0_i32_0, %c0_i32_1 : i32, i32, i32
  }
  func.func @transform_4(%arg0: i32) -> (i32, i32) {
    %c0_i32 = arith.constant 0 : i32
    %c0_i32_0 = arith.constant 0 : i32
    %c0_i32_1 = arith.constant 0 : i32
    return %c0_i32, %c0_i32_0 : i32, i32
  }
  func.func @transform_5(%arg0: i32) -> (i32, i32) {
    %c0_i32 = arith.constant 0 : i32
    %c0_i32_0 = arith.constant 0 : i32
    %c0_i32_1 = arith.constant 0 : i32
    return %c0_i32, %c0_i32_0 : i32, i32
  }
  func.func @transform_6(%arg0: i32) -> (i32, i32) {
    %c0_i32 = arith.constant 0 : i32
    %c0_i32_0 = arith.constant 0 : i32
    %c0_i32_1 = arith.constant 0 : i32
    return %c0_i32, %c0_i32_0 : i32, i32
  }
  func.func @transform_7(%arg0: i32) -> (i32, i32) {
    %c0_i32 = arith.constant 0 : i32
    %c0_i32_0 = arith.constant 0 : i32
    %c0_i32_1 = arith.constant 0 : i32
    return %c0_i32, %c0_i32_0 : i32, i32
  }
  func.func @transform_8(%arg0: i32) -> (i32, i32) {
    %c0_i32 = arith.constant 0 : i32
    %c0_i32_0 = arith.constant 0 : i32
    %c0_i32_1 = arith.constant 0 : i32
    return %c0_i32, %c0_i32_0 : i32, i32
  }
  func.func @transform_9(%arg0: i32) -> (i32, i32) {
    %c0_i32 = arith.constant 0 : i32
    %c0_i32_0 = arith.constant 0 : i32
    %c0_i32_1 = arith.constant 0 : i32
    return %c0_i32, %c0_i32_0 : i32, i32
  }
  func.func @transform_10(%arg0: i32) -> (i32, i32) {
    %c0_i32 = arith.constant 0 : i32
    %c0_i32_0 = arith.constant 0 : i32
    %c0_i32_1 = arith.constant 0 : i32
    return %c0_i32, %c0_i32_0 : i32, i32
  }
  func.func @transform_11(%arg0: i32) -> (i32, i32) {
    %c0_i32 = arith.constant 0 : i32
    %c0_i32_0 = arith.constant 0 : i32
    %c0_i32_1 = arith.constant 0 : i32
    return %c0_i32, %c0_i32_0 : i32, i32
  }
  func.func @transform_12(%arg0: i32) -> (i32, i32) {
    %c0_i32 = arith.constant 0 : i32
    %c0_i32_0 = arith.constant 0 : i32
    %c0_i32_1 = arith.constant 0 : i32
    return %c0_i32, %c0_i32_0 : i32, i32
  }
  func.func @transform_13(%arg0: i32) -> (i32, i32, i32) {
    %c0_i32 = arith.constant 0 : i32
    %c0_i32_0 = arith.constant 0 : i32
    %c0_i32_1 = arith.constant 0 : i32
    return %arg0, %c0_i32, %c0_i32_0 : i32, i32, i32
  }
}

</mosaic_0001>

<bundles_post_ra>
// kernel: tpu_custom_call.1
= control target key start
LH: loop header
LB: loop body
LE: loop exit
PB: predicated region body
PF: predicated region fallthrough
CT: control target
= control target key end

     0   :  { %s3833_s0 = inlined_call_operand.hbm [shape: f32[2,8,128], index: 0, kind: input, shape index: {}]   ;;  %s3834_s1 = inlined_call_operand.hbm [shape: f32[128,384], index: 1, kind: input, shape index: {}]   ;;  %s3835_s2 = inlined_call_operand.vmem [shape: f32[1,384], index: 2, kind: input, shape index: {}]   ;;  %s3836_s3 = inlined_call_operand.hbm [shape: f32[8,16,128], index: 3, kind: input, shape index: {}]   ;;  %s3837_s4 = inlined_call_operand.vmem [shape: f32[1,128], index: 4, kind: input, shape index: {}]   ;;  %s3838_s5 = inlined_call_operand.vmem [shape: f32[1,128], index: 5, kind: input, shape index: {}]   ;;  %s3839_s6 = inlined_call_operand.vmem [shape: f32[1,128], index: 6, kind: input, shape index: {}]   ;;  %s3840_s7 = inlined_call_operand.hbm [shape: f32[128,512], index: 7, kind: input, shape index: {}]   ;;  %s3841_s8 = inlined_call_operand.vmem [shape: f32[1,512], index: 8, kind: input, shape index: {}]   ;;  %s3842_s9 = inlined_call_operand.hbm [shape: f32[512,128], index: 9, kind: input, shape index: {}]   ;;  %s3843_s10 = inlined_call_operand.vmem [shape: f32[1,128], index: 10, kind: input, shape index: {}]   ;;  %s3844_s11 = inlined_call_operand.vmem [shape: f32[1,128], index: 11, kind: input, shape index: {}]   ;;  %s3845_s12 = inlined_call_operand.vmem [shape: f32[1,128], index: 12, kind: input, shape index: {}]   ;;  %s3846_s13 = inlined_call_operand.hbm [shape: f32[2,8,128], index: 13, kind: output, shape index: {}]  }
   0x1   :  { %3851 = sst [smem:[#allocation16_spill]] %s3833_s0 }
   0x2   :  { %3852 = sst [smem:[#allocation17_spill]] %s3834_s1 }
   0x3   :  { %3853 = sst [smem:[#allocation18_spill]] %s3841_s8 }
   0x4   :  { %3854 = sst [smem:[#allocation19_spill]] %s3843_s10 }
   0x5   :  { %3855 = sst [smem:[#allocation20_spill]] %s3844_s11 }
   0x6   :  { %3856 = sst [smem:[#allocation21_spill]] %s3845_s12 }
   0x7   :  { %3857 = sst [smem:[#allocation22_spill]] %s3846_s13 }
   0x8   :  { %18 = vsyncpa [#allocation3], 0 }
   0x9   :  { %20 = vsyncpa [#allocation3 + $0x1], 0 }
   0xa   :  { %21 = vsyncpa [#allocation6], 0 }
   0xb   :  { %22 = vsyncpa [#allocation9], 0 }
   0xc   :  { %23 = vsyncpa [#allocation4], 0 }
   0xd   :  { %25 = vsyncpa [#allocation4 + $0x1], 0  ;;  %s3304_s25 = smov 0   ;;  %s3306_s26 = smov 0  }
   0xe   :  { %s3308_s27 = smov 0   ;;  %s3310_s28 = smov 0  }
   0xf LB: > { %s3212_s29 = smov [#allocation5]   ;;  %s3325_s14 = sadd.s32 4294967295, %s3210_s28   ;;  %s3210_s28 = sphi %s3310_s28, %s3885_s28   ;;  %s3206_s27 = sphi %s3308_s27, %s3884_s27   ;;  %s3202_s26 = sphi %s3306_s26, %s3883_s26   ;;  %s3198_s25 = sphi %s3304_s25, %s3882_s25  }
  0x10   : > { %s352_s30 = sshll.u32 %s3212_s29, 4  ;;  %p2541_p0 = scmp.ge.s32.totalorder %s3210_s28, 1  ;;  %s3330_s30 = int_to_ptr.vmem [resolvable:$true] %s352_s30 }
  0x11   : > { %p3848_p1 = scmp.eq.s32.totalorder %s3325_s14, 0  ;;  %p340_p2 = scmp.lt.s32.totalorder %s3210_s28, 3 }
  0x12   : > { %s3213_s16 = smov [#allocation8]   ;;  %s3214_s19 = smov [#allocation7]  }
  0x13   : > { %p3332_p3 = pnand %p2541_p0, %p340_p2  ;;  %s390_s17 = sshll.u32 %s3213_s16, 4  ;;  %s3345_s17 = int_to_ptr.vmem [resolvable:$true] %s390_s17 }
  0x14   : > { %s3347_s20 = sshll.u32 %s3214_s19, 4  ;;  %s3860_s1 = sld [smem:[#allocation17_spill]]  ;;  %s369_s20 = int_to_ptr.vmem [resolvable:$true] %s3347_s20 }
  0x15   : > { %s3858_s15 = scalar_select %p3332_p3, 1, 0 }
  0x16   : > { %p2875_p5 = pneg %p3332_p3 }
  0x18   : > { %p3341_p6 = pnand %p2875_p5, %p3848_p1 }
  0x1a   : > { %s2994_s23 = scalar_lea.hbm %s3860_s1, 6144  ;;  %p3357_p8 = pneg %p3341_p6 }
  0x1b   : > { %p2995_p7 = scmp.ne.s32.totalorder %s3860_s1, %s2994_s23  ;;  %p3001_p11 = scmp.lt.u32.totalorder %s2994_s23, %s3860_s1 }
  0x1d   : > { %p2997_p9 = pnand %p3357_p8, %p2995_p7 }
  0x1f   : > { %p2998_p10 = pneg %p2997_p9 }
  0x21   : > { %p3003_p12 = pnand %p3001_p11, %p2998_p10 }
  0x23   : > { %3006 = shalt.err (!%p3003_p12)
}
  0x24   : > { %s3007_s21 = scalar_lea.vmem %s3330_s30, 6144  ;;  %p3015_p5 = scmp.lt.s32.totalorder %s3330_s30, %s3330_s30 }
  0x25   : > { %p3008_p13 = scmp.ne.s32.totalorder %s3330_s30, %s3007_s21  ;;  %p3016_p4 = scmp.lt.s32.totalorder %s3007_s21, %s3007_s21 }
  0x27   : > { %p3010_p0 = pnand %p3008_p13, %p3357_p8  ;;  %p3017_p7 = por %p3016_p4, %p3015_p5 }
  0x29   : > { %p3011_p2 = pneg %p3010_p0 }
  0x2b   : > { %p3018_p9 = pnand %p3017_p7, %p3011_p2 }
  0x2d   : > { %3021 = shalt.err (!%p3018_p9)
}
  0x2e   : > { %s3215_s22 = smov 384   ;;  %s3216_s13 = smov 24  }
  0x2f   : > { %2878 = dma.hbm_to_vmem [thread:$0]  (!%p3341_p6), %s3860_s1, 6144, %s3330_s30, [#allocation6], %s3215_s22, %s3215_s22, %s3216_s13  }
  0x30   : > { %s3022_s12 = scalar_lea.hbm %s3840_s7, 8192 }
  0x31   : > { %p3023_p4 = scmp.ne.s32.totalorder %s3840_s7, %s3022_s12  ;;  %p3029_p12 = scmp.lt.u32.totalorder %s3022_s12, %s3840_s7 }
  0x33   : > { %p3025_p10 = pnand %p3023_p4, %p3357_p8 }
  0x35   : > { %p3026_p11 = pneg %p3025_p10 }
  0x37   : > { %p3031_p13 = pnand %p3029_p12, %p3026_p11 }
  0x39   : > { %3034 = shalt.err (!%p3031_p13)
}
  0x3a   : > { %s3035_s30 = scalar_lea.vmem %s3345_s17, 8192  ;;  %p3043_p7 = scmp.lt.s32.totalorder %s3345_s17, %s3345_s17 }
  0x3b   : > { %p3036_p0 = scmp.ne.s32.totalorder %s3345_s17, %s3035_s30  ;;  %p3044_p9 = scmp.lt.s32.totalorder %s3035_s30, %s3035_s30 }
  0x3d   : > { %p3038_p2 = pnand %p3036_p0, %p3357_p8  ;;  %p3045_p4 = por %p3044_p9, %p3043_p7 }
  0x3f   : > { %p3039_p5 = pneg %p3038_p2 }
  0x41   : > { %p3046_p10 = pnand %p3045_p4, %p3039_p5 }
  0x43   : > { %3049 = shalt.err (!%p3046_p10)
}
  0x44   : > { %s3217_s10 = smov 512   ;;  %s3218_s8 = smov 32  }
  0x45   : > { %2884 = dma.hbm_to_vmem [thread:$0]  (!%p3341_p6), %s3840_s7, 8192, %s3345_s17, [#allocation9], %s3217_s10, %s3217_s10, %s3218_s8  }
  0x46   : > { %s3050_s23 = scalar_lea.hbm %s3836_s3, 2048 }
  0x47   : > { %p3051_p11 = scmp.ne.s32.totalorder %s3836_s3, %s3050_s23  ;;  %p3057_p0 = scmp.lt.u32.totalorder %s3050_s23, %s3836_s3 }
  0x49   : > { %p3053_p12 = pnand %p3051_p11, %p3357_p8 }
  0x4b   : > { %p3054_p13 = pneg %p3053_p12 }
  0x4d   : > { %p3059_p2 = pnand %p3057_p0, %p3054_p13 }
  0x4f   : > { %3062 = shalt.err (!%p3059_p2)
}
  0x50   : > { %s3063_s30 = scalar_lea.vmem %s369_s20, 2048  ;;  %p3071_p4 = scmp.lt.s32.totalorder %s369_s20, %s369_s20 }
  0x51   : > { %p3064_p5 = scmp.ne.s32.totalorder %s369_s20, %s3063_s30  ;;  %p3072_p10 = scmp.lt.s32.totalorder %s3063_s30, %s3063_s30 }
  0x53   : > { %p3066_p7 = pnand %p3064_p5, %p3357_p8  ;;  %p3073_p1 = por %p3072_p10, %p3071_p4 }
  0x55   : > { %p3067_p9 = pneg %p3066_p7 }
  0x57   : > { %p3074_p3 = pnand %p3073_p1, %p3067_p9 }
  0x59   : > { %3077 = shalt.err (!%p3074_p3)
}
  0x5a   : > { %s3219_s17 = smov 128   ;;  %s3220_s10 = smov 8  }
  0x5b   : > { %2881 = dma.hbm_to_vmem [thread:$0]  (!%p3341_p6), %s3836_s3, 2048, %s369_s20, [#allocation6], %s3219_s17, %s3219_s17, %s3220_s10  }
  0x5c   : > { %s3221_s12 = smov [#allocation10]   ;;  %s3078_s24 = scalar_lea.hbm %s3842_s9, 8192 }
  0x5d   : > { %s406_s22 = sshll.u32 %s3221_s12, 4  ;;  %p3079_p1 = scmp.ne.s32.totalorder %s3842_s9, %s3078_s24  ;;  %s407_s22 = int_to_ptr.vmem [resolvable:$true] %s406_s22 }
  0x5e   : > { %p3085_p12 = scmp.lt.u32.totalorder %s3078_s24, %s3842_s9 }
  0x5f   : > { %p3081_p3 = pnand %p3079_p1, %p3357_p8 }
  0x61   : > { %p3082_p11 = pneg %p3081_p3 }
  0x63   : > { %p3087_p13 = pnand %p3085_p12, %p3082_p11 }
  0x65   : > { %3090 = shalt.err (!%p3087_p13)
}
  0x66   : > { %s3091_s20 = scalar_lea.vmem %s407_s22, 8192  ;;  %p3099_p7 = scmp.lt.s32.totalorder %s407_s22, %s407_s22 }
  0x67   : > { %p3092_p0 = scmp.ne.s32.totalorder %s407_s22, %s3091_s20  ;;  %p3100_p9 = scmp.lt.s32.totalorder %s3091_s20, %s3091_s20 }
  0x69   : > { %p3094_p2 = pnand %p3092_p0, %p3357_p8  ;;  %p3101_p4 = por %p3100_p9, %p3099_p7 }
  0x6b   : > { %p3095_p5 = pneg %p3094_p2 }
  0x6d   : > { %p3102_p10 = pnand %p3101_p4, %p3095_p5 }
  0x6f   : > { %3105 = shalt.err (!%p3102_p10)
}
  0x70   : > { %2887 = dma.hbm_to_vmem [thread:$0]  (!%p3341_p6), %s3842_s9, 8192, %s407_s22, [#allocation9], %s3219_s17, %s3219_s17, %s3220_s10  }
  0x71   : > { %s2540_s16 = sadd.s32 4294967294, %s3210_s28   ;;  %s3440_s18 = sadd.s32 1, %s3210_s28  }
  0x72   : > { %s35_s12 = ssub.s32 %s3210_s28, %s3440_s18  ;;  %s38_s13 = sadd.s32 1, %s3206_s27 }
  0x73   : > { %p36_p8 = scmp.eq.s32.totalorder %s35_s12, 0  ;;  %p45_p1 = scmp.ne.s32.totalorder %s3206_s27, %s3202_s26 }
  0x74   : > { %p46_p3 = scmp.eq.s32.totalorder %s3210_s28, 0  ;;  %p51_p11 = scmp.ne.s32.totalorder %s3202_s26, %s3198_s25 }
  0x75   : > { %s3451_s23 = scalar_select %p36_p8, %s3206_s27, %s38_s13  }
  0x76   : > { %p3453_p12 = por %p46_p3, %p45_p1  ;;  %p3863_p13 = scmp.eq.s32.totalorder %s3325_s14, 0 }
  0x77   : > { %p327_p0 = scmp.eq.s32.totalorder %s3325_s14, 1  ;;  %p333_p2 = scmp.eq.s32.totalorder %s2540_s16, 1 }
  0x78   : > { %p3459_p6 = por %p3863_p13, %p51_p11  ;;  %p2900_p5 = scmp.lt.s32.totalorder %s3210_s28, 2 }
  0x79   : > { %s429_s10 = sand.u32 1, %s3206_s27   ;;  %p3466_p7 = por %p327_p0, %p45_p1 }
  0x7a   : > { %p3470_p9 = por %p333_p2, %p51_p11  ;;  %s2547_s19 = sshll.u32 %s429_s10, 3 }
  0x7b   : > { %s3865_s22 = scalar_select %p3466_p7, 1, 0 }
  0x7c   : > { %s3866_s29 = scalar_select %p3470_p9, 1, 0 }
  0x7d   : > { %s2548_s21 = sshll.u32 %s3210_s28, 7  ;;  %s3867_s0 = sld [smem:[#allocation16_spill]] }
  0x7e   : > { %s433_s11 = scalar_lea.vmem [#allocation2], %s2547_s19  ;;  %p3484_p4 = pnand %p2900_p5, %p3453_p12 }
  0x7f   : > { %s440_s16 = sshll.u32 %s433_s11, 4  ;;  %s430_s13 = scalar_lea.sflag [#allocation3], %s429_s10  ;;  %s3480_s16 = int_to_ptr.vmem [resolvable:$true] %s440_s16 }
  0x80   : > { %p3108_p8 = pneg %p3484_p4 }
  0x83   : > { %s3478_s8 = scalar_lea.hbm %s3867_s0, %s2548_s21  ;;  %s3111_s30 = scalar_lea.hbm %s3867_s0, 256 }
  0x84   : > { %s3106_s1 = scalar_lea.hbm %s3478_s8, 128  ;;  %p3112_p11 = scmp.lt.u32.totalorder %s3478_s8, %s3867_s0 }
  0x85   : > { %p3107_p10 = scmp.ne.s32.totalorder %s3478_s8, %s3106_s1  ;;  %p3113_p12 = scmp.lt.u32.totalorder %s3111_s30, %s3106_s1 }
  0x86   : > { %p3115_p0 = scmp.lt.u32.totalorder %s3106_s1, %s3478_s8 }
  0x87   : > { %p3109_p1 = pnand %p3108_p8, %p3107_p10  ;;  %p3114_p13 = por %p3113_p12, %p3112_p11 }
  0x89   : > { %p3110_p3 = pneg %p3109_p1  ;;  %p3116_p2 = por %p3115_p0, %p3114_p13 }
  0x8b   : > { %p3117_p5 = pnand %p3116_p2, %p3110_p3 }
  0x8d   : > { %3120 = shalt.err (!%p3117_p5)
}
  0x8e   : > { %s3121_s10 = scalar_lea.vmem %s3480_s16, 128  ;;  %s3222_s11 = smov [#allocation2]  }
  0x8f   : > { %p3122_p10 = scmp.ne.s32.totalorder %s3480_s16, %s3121_s10  ;;  %s3126_s19 = sshll.u32 %s3222_s11, 4  ;;  %s3127_s19 = int_to_ptr.vmem [resolvable:$false] %s3126_s19 }
  0x90   : > { %s3128_s21 = scalar_lea.vmem %s3127_s19, 256  ;;  %p3129_p7 = scmp.lt.s32.totalorder %s3480_s16, %s3127_s19 }
  0x91   : > { %p3124_p1 = pnand %p3122_p10, %p3108_p8  ;;  %p3130_p11 = scmp.lt.s32.totalorder %s3128_s21, %s3121_s10 }
  0x93   : > { %p3125_p9 = pneg %p3124_p1  ;;  %p3131_p12 = por %p3130_p11, %p3129_p7 }
  0x95   : > { %p3132_p13 = pnand %p3131_p12, %p3125_p9 }
  0x97   : > { %3135 = shalt.err (!%p3132_p13)
}
  0x98   : > { %2891 = dma.hbm_to_vmem [thread:$0]  (!%p3484_p4), %s3478_s8, 128, %s3480_s16, %s430_s13  }
  0x99   : > { %p3869_p3 = scmp.ne.s32.totalorder %s3858_s15, 0 }
  0x9a   : > { %s3516_s1 = sand.u32 (!%p3869_p3), 1, %s3202_s26  }
  0x9b   : > { %449 = sbr.rel (%p3869_p3) target bundleno = 4221 (0x107d), region = 72  ;;  %s2550_s30 = sshll.u32 (!%p3869_p3), %s3516_s1, 3 }
  0x9c   : > { %s452_s24 = scalar_lea.sflag (!%p3869_p3), [#allocation3], %s3516_s1  ;;  %s3522_s20 = scalar_lea.vmem (!%p3869_p3), [#allocation2], %s2550_s30 }
  0xa2   : > { %3181 = dma.done.wait (%p3459_p6), %s452_s24, 128  }
  0xa3   : > { %3183 = vsyncadd (%p3459_p6), %s452_s24, 4294967168  ;;  %p3870_p7 = scmp.eq.s32.totalorder %s3325_s14, 0 }
  0xa5   : > { %3185 = dma.done.wait (%p3870_p7), [#allocation6], 8192   ;;  %p3871_p9 = pmov %p3870_p7 }
  0xa6   : > { %p3872_p4 = pmov %p3870_p7 }
  0xa7   : > { %3187 = vsyncadd (%p3871_p9), [#allocation6], 4294959104 }
  0xa8   : > { %3189 = dma.done.wait (%p3872_p4), [#allocation9], 16384   ;;  %p3873_p8 = pmov %p3872_p4 }
  0xa9   : > { %v3223_v0 = vmov 0   ;;  %v518_v1 = vld [vmem:[#allocation5 + $0x8] sm:$0xff]  ;;  %v521_v2 = vld [vmem:[#allocation5 + $0x20] sm:$0xff]  ;;  %v520_v5 = vld [vmem:[#allocation5 + $0x18] sm:$0xff]  ;;  %v3224_v51 = vmov 0.0   ;;  %vm3225_vm0 = vmmov 0  }
  0xaa   : > { %3191 = vsyncadd (%p3873_p8), [#allocation9], 4294950912  ;;  %638 = vmatprep.mubr.bf16.mxu0 %v3223_v0  ;;  %v517_v3 = vld [vmem:[#allocation5] sm:$0xff]  ;;  %v566_v4 = vpack.c.bf16 %v521_v2, %v518_v1  ;;  %v524_v6 = vld [vmem:[#allocation5 + $0x38] sm:$0xff]  ;;  %2691 = vmatprep.subr.bf16.mxu1 %v3224_v51  ;;  %vm691_vm1 = vcmask 130048   ;;  %s3226_s8 = smov 112  }
  0xab   : > { %v527_v7 = vld [vmem:[#allocation5 + $0x50] sm:$0xff]  ;;  %v565_v8 = vpack.c.bf16 %v520_v5, %v517_v3  ;;  %v526_v11 = vld [vmem:[#allocation5 + $0x48] sm:$0xff]  ;;  %v533_v13 = vld [vmem:[#allocation5 + $0x80] sm:$0xff]  ;;  %2707 = vmatprep.mubr.msk.bf16.mxu1 %vm3225_vm0, %v3224_v51  ;;  %vm738_vm2 = vcmask 64512   ;;  %s3227_s16 = smov 96   ;;  %vm916_vm3 = vcmask 1043456  }
  0xac   : > { %v569_v9 = vpack.c.bf16 %v527_v7, %v524_v6  ;;  %v523_v10 = vld [vmem:[#allocation5 + $0x30] sm:$0xff]  ;;  %v530_v12 = vld [vmem:[#allocation5 + $0x68] sm:$0xff]  ;;  %606 = vmatprep.subr.bf16.mxu0 %v566_v4  ;;  %v529_v16 = vld [vmem:[#allocation5 + $0x60] sm:$0xff]  ;;  %s3228_s12 = smov 80   ;;  %s3229_s13 = smov 64  }
  0xad   : > { %607 = vmatpush1.bf16.msra.mxu0 %v565_v8  ;;  %v568_v14 = vpack.c.bf16 %v526_v11, %v523_v10  ;;  %v572_v15 = vpack.c.bf16 %v533_v13, %v530_v12  ;;  %v532_v17 = vld [vmem:[#allocation5 + $0x78] sm:$0xff]  ;;  %v539_v19 = vld [vmem:[#allocation5 + $0xb0] sm:$0xff]  ;;  %v538_v23 = vld [vmem:[#allocation5 + $0xa8] sm:$0xff]  ;;  %v591_v13 = vlaneseq  ;;  %s3230_s10 = smov 48   ;;  %s3231_s11 = smov 32  }
  0xae   : > { %608 = vmatprep.subr.bf16.mxu0 %v569_v9  ;;  %v536_v18 = vld [vmem:[#allocation5 + $0x98] sm:$0xff]  ;;  %v571_v20 = vpack.c.bf16 %v532_v17, %v529_v16  ;;  %v535_v22 = vld [vmem:[#allocation5 + $0x90] sm:$0xff]  ;;  %v542_v24 = vld [vmem:[#allocation5 + $0xc8] sm:$0xff]  ;;  %s3232_s19 = smov 16   ;;  %s2419_s21 = scalar_lea.sflag [#allocation4], %s3516_s1 }
  0xaf   : > { %v575_v21 = vpack.c.bf16 %v539_v19, %v536_v18  ;;  %v545_v25 = vld [vmem:[#allocation5 + $0xe0] sm:$0xff]  ;;  %v574_v26 = vpack.c.bf16 %v538_v23, %v535_v22  ;;  %v544_v29 = vld [vmem:[#allocation5 + $0xd8] sm:$0xff]  ;;  %v551_v31 = vld [vmem:[#allocation5 + $0x110] sm:$0xff]  ;;  %p3879_p0 = scmp.ne.s32.totalorder %s3865_s22, 0 }
  0xb0   : > { %v578_v27 = vpack.c.bf16 %v545_v25, %v542_v24  ;;  %v541_v28 = vld [vmem:[#allocation5 + $0xc0] sm:$0xff]  ;;  %v548_v30 = vld [vmem:[#allocation5 + $0xf8] sm:$0xff]  ;;  %v547_v34 = vld [vmem:[#allocation5 + $0xf0] sm:$0xff] }
  0xb1   : > { %609 = vmatpush1.bf16.msra.mxu0 %v568_v14  ;;  %v577_v32 = vpack.c.bf16 %v544_v29, %v541_v28  ;;  %v581_v33 = vpack.c.bf16 %v551_v31, %v548_v30  ;;  %v550_v35 = vld [vmem:[#allocation5 + $0x108] sm:$0xff]  ;;  %v557_v37 = vld [vmem:[#allocation5 + $0x140] sm:$0xff]  ;;  %v556_v41 = vld [vmem:[#allocation5 + $0x138] sm:$0xff]  ;;  %v3558_v14 = vshrl.u32 %v591_v13, 7 }
  0xb2   : > { %610 = vmatprep.subr.bf16.mxu0 %v572_v15  ;;  %v554_v36 = vld [vmem:[#allocation5 + $0x128] sm:$0xff]  ;;  %v580_v38 = vpack.c.bf16 %v550_v35, %v547_v34  ;;  %v553_v40 = vld [vmem:[#allocation5 + $0x120] sm:$0xff]  ;;  %v560_v42 = vld [vmem:[#allocation5 + $0x158] sm:$0xff] }
  0xb3   : > { %v584_v39 = vpack.c.bf16 %v557_v37, %v554_v36  ;;  %v563_v43 = vld [vmem:[#allocation5 + $0x170] sm:$0xff]  ;;  %v583_v44 = vpack.c.bf16 %v556_v41, %v553_v40  ;;  %v562_v47 = vld [vmem:[#allocation5 + $0x168] sm:$0xff]  ;;  %v525_v54 = vld [vmem:[#allocation5 + $0x40] sm:$0xff]  ;;  %v593_v15 = vsub.s32 0, %v3558_v14  ;;  %v597_v17 = vsub.s32 1, %v3558_v14 }
  0xb4   : > { %v587_v45 = vpack.c.bf16 %v563_v43, %v560_v42  ;;  %v559_v46 = vld [vmem:[#allocation5 + $0x150] sm:$0xff]  ;;  %v522_v53 = vld [vmem:[#allocation5 + $0x28] sm:$0xff]  ;;  %v528_v56 = vld [vmem:[#allocation5 + $0x58] sm:$0xff]  ;;  %v601_v35 = vsub.s32 2, %v3558_v14 }
  0xb5   : > { %611 = vmatpush1.bf16.msra.mxu0 %v571_v20  ;;  %v586_v48 = vpack.c.bf16 %v562_v47, %v559_v46  ;;  %v3538_v49 = vld [vmem:[%s3522_s20] sm:$0xff]  ;;  %v570_v57 = vpack.c.bf16 %v528_v56, %v525_v54  ;;  %v534_v59 = vld [vmem:[#allocation5 + $0x88] sm:$0xff]  ;;  %v537_v61 = vld [vmem:[#allocation5 + $0xa0] sm:$0xff]  ;;  %s3876_s20 = sld [smem:[#allocation20_spill]] }
  0xb6   : > { %612 = vmatprep.subr.bf16.mxu0 %v575_v21  ;;  %v516_v50 = vpack.c.bf16 %v3538_v49, %v3538_v49  ;;  %v519_v52 = vld [vmem:[#allocation5 + $0x10] sm:$0xff]  ;;  %v540_v62 = vld [vmem:[#allocation5 + $0xb8] sm:$0xff]  ;;  %v546_v2 = vld [vmem:[#allocation5 + $0xe8] sm:$0xff] }
  0xb7   : > { %v567_v55 = vpack.c.bf16 %v522_v53, %v519_v52  ;;  %v531_v58 = vld [vmem:[#allocation5 + $0x70] sm:$0xff]  ;;  %v576_v63 = vpack.c.bf16 %v540_v62, %v537_v61  ;;  %v549_v4 = vld [vmem:[#allocation5 + $0x100] sm:$0xff]  ;;  %v552_v5 = vld [vmem:[#allocation5 + $0x118] sm:$0xff] }
  0xb8   : > { %v573_v60 = vpack.c.bf16 %v534_v59, %v531_v58  ;;  %v543_v1 = vld [vmem:[#allocation5 + $0xd0] sm:$0xff]  ;;  %v582_v6 = vpack.c.bf16 %v552_v5, %v549_v4  ;;  %v558_v8 = vld [vmem:[#allocation5 + $0x148] sm:$0xff]  ;;  %v561_v10 = vld [vmem:[#allocation5 + $0x160] sm:$0xff] }
  0xb9   : > { %613 = vmatpush1.bf16.msra.mxu0 %v574_v26  ;;  %2692 = vmatpush3.bf16.msra.mxu1 %v567_v55  ;;  %v579_v3 = vpack.c.bf16 %v546_v2, %v543_v1  ;;  %v555_v7 = vld [vmem:[#allocation5 + $0x130] sm:$0xff]  ;;  %v564_v11 = vld [vmem:[#allocation5 + $0x178] sm:$0xff]  ;;  %v750_v30 = vld [vmem:[#allocation7] sm:$0xff] }
  0xba   : > { %614 = vmatprep.subr.bf16.mxu0 %v578_v27  ;;  %2693 = vmatprep.subr.bf16.mxu1 %v3224_v51  ;;  %v585_v9 = vpack.c.bf16 %v558_v8, %v555_v7  ;;  %v588_v12 = vpack.c.bf16 %v564_v11, %v561_v10  ;;  %v589_v16 = vld [vmem:[%s3835_s2] sm:$0x7]  ;;  %v751_v31 = vld [vmem:[#allocation7 + $0x8] sm:$0xff] }
  0xbb   : > { %v594_v18 = vrot.slane %v589_v16, %v593_v15  ;;  %v598_v19 = vrot.slane %v589_v16, %v597_v17  ;;  %v602_v37 = vrot.slane %v589_v16, %v601_v35 }
  0xbd   : > { %615 = vmatpush1.bf16.msra.mxu0 %v577_v32  ;;  %2694 = vmatpush3.bf16.msra.mxu1 %v570_v57  ;;  %v752_v32 = vpack.c.bf16 %v751_v31, %v750_v30 }
  0xbe   : > { %616 = vmatprep.subr.bf16.mxu0 %v581_v33  ;;  %2695 = vmatprep.subr.bf16.mxu1 %v3224_v51 }
  0xc1   : > { %617 = vmatpush1.bf16.msra.mxu0 %v580_v38  ;;  %2696 = vmatpush3.bf16.msra.mxu1 %v573_v60 }
  0xc2   : > { %618 = vmatprep.subr.bf16.mxu0 %v584_v39  ;;  %2697 = vmatprep.subr.bf16.mxu1 %v3224_v51 }
  0xc5   : > { %619 = vmatpush1.bf16.msra.mxu0 %v583_v44  ;;  %2698 = vmatpush3.bf16.msra.mxu1 %v576_v63 }
  0xc6   : > { %620 = vmatprep.subr.bf16.mxu0 %v587_v45  ;;  %2699 = vmatprep.subr.bf16.mxu1 %v3224_v51 }
  0xc9   : > { %621 = vmatpush1.bf16.msra.mxu0 %v586_v48  ;;  %2700 = vmatpush3.bf16.msra.mxu1 %v579_v3  ;;  %v862_v48 = vld [vmem:[#allocation7 + $0x10] sm:$0xff] }
  0xca   : > { %2711 = vmatprep.subr.bf16.mxu0 %v3224_v51  ;;  %2701 = vmatprep.subr.bf16.mxu1 %v3224_v51 }
  0xcc   : > { %639 = vmatmul.mubr.bf16.vlgmr.msra.gmra.mrb[0].mxu0 %v516_v50 }
  0xcd   : > { %2713 = vmatprep.mubr.msk.bf16.mxu0 %vm3225_vm0, %v3224_v51  ;;  %2702 = vmatpush3.bf16.msra.mxu1 %v582_v6 }
  0xce   : > { %2703 = vmatprep.subr.bf16.mxu1 %v3224_v51 }
  0xd1   : > { %2704 = vmatpush3.bf16.msra.mxu1 %v585_v9 }
  0xd2   : > { %2705 = vmatprep.subr.bf16.mxu1 %v3224_v51 }
  0xd5   : > { %2706 = vmatpush3.bf16.msra.mxu1 %v588_v12 }
  0xd6   : > { %2717 = vmatprep.subr.bf16.mxu1 %v3224_v51 }
  0xd8   : > { %2708 = vmatmul.mubr.bf16.vlgmr.msra.gmra.mrb[0].mxu1 %v516_v50  ;;  %v863_v50 = vld [vmem:[#allocation7 + $0x18] sm:$0xff] }
  0xd9   : > { %2719 = vmatprep.mubr.msk.bf16.mxu1 %vm3225_vm0, %v3224_v51  ;;  %2718 = vmatpush3.bf16.msra.mxu1 %v752_v32  ;;  %v864_v52 = vpack.c.bf16 %v863_v50, %v862_v48  ;;  %v1068_v32 = vld [vmem:[#allocation7 + $0x20] sm:$0xff] }
  0xda   : > { %2729 = vmatprep.subr.bf16.mxu1 %v3224_v51 }
 0x19f   : > { %v640_v20 = vpop.f32.mrb[0].mxu0 }
 0x1a0   : > { %v641_v21 = vadd.f32 %v640_v20, %v594_v18  ;;  %v642_v22 = vpop.f32.mrb[1].mxu0 }
 0x1a1   : > { %v643_v23 = vadd.f32 %v642_v22, %v598_v19  ;;  %v644_v24 = vpop.f32.mrb[2].mxu0 }
 0x1a2   : > { %v645_v25 = vpop.f32.mrb[3].mxu0  ;;  %v687_v26 = vmul.f32 0.25, %v641_v21 }
 0x1a3   : > { %v3569_v27 = vpack.c.bf16 %v643_v23, %v643_v23 }
 0x1a4   : > { %v3574_v29 = vpack.c.bf16 %v687_v26, %v687_v26 }
 0x1a5   : > { %802 = vrot.lane.b32.xlu0 %v3569_v27, %s3226_s8  ;;  %v696_v28 = vsel %vm691_vm1, %v3569_v27, 0 }
 0x1a6   : > { %2712 = vmatpush3.bf16.xpose.msra.mxu0 %v696_v28 }
 0x1a7   : > { %2723 = vmatprep.subr.bf16.mxu0 %v3224_v51 }
 0x1a9   : > { %799 = vrot.lane.b32.xlu0 %v3574_v29, %s3226_s8 }
 0x1ab   : > { %v681_v38 = vpop.f32.mrb[0].mxu1 }
 0x1ac   : > { %v682_v39 = vadd.f32 %v681_v38, %v602_v37  ;;  %v2709_v40 = vpop.f32.mrb[1].mxu1 }
 0x1ad   : > { %2714 = vmatmul.mubr.msk.bf16.vlgmr.msra.gmra.mrb[4].mxu0 %vm691_vm1, %v3574_v29  ;;  %v684_v41 = vpop.f32.mrb[2].mxu1 }
 0x1ae   : > { %2725 = vmatprep.mubr.msk.bf16.mxu0 %vm3225_vm0, %v3224_v51  ;;  %v3591_v42 = vpack.c.bf16 %v682_v39, %v682_v39  ;;  %v2710_v43 = vpop.f32.mrb[3].mxu1 }
 0x1b0   : > { %866 = vrot.lane.b32.xlu1 %v3591_v42, %s3226_s8  ;;  %2720 = vmatmul.mubr.msk.bf16.vlgmr.msra.gmra.mrb[4].mxu1 %vm691_vm1, %v3591_v42  ;;  %s3877_s8 = sld [smem:[#allocation21_spill]] }
 0x1b1   : > { %2731 = vmatprep.mubr.msk.bf16.mxu1 %vm3225_vm0, %v3224_v51  ;;  %2730 = vmatpush3.bf16.msra.mxu1 %v864_v52 }
 0x1b2   : > { %2741 = vmatprep.subr.bf16.mxu1 %v3224_v51 }
 0x217   : > { %v803_v33 = vpop.permute.xlu0 %802 }
 0x218   : > { %v808_v34 = vsel %vm691_vm1, %v803_v33, 0  ;;  %v1069_v33 = vld [vmem:[#allocation7 + $0x28] sm:$0xff] }
 0x219   : > { %2724 = vmatpush3.bf16.xpose.msra.mxu0 %v808_v34  ;;  %v1070_v37 = vpack.c.bf16 %v1069_v33, %v1068_v32 }
 0x21a   : > { %2735 = vmatprep.subr.bf16.mxu0 %v3224_v51 }
 0x21b   : > { %v800_v36 = vpop.permute.xlu0 %799 }
 0x220   : > { %2726 = vmatmul.mubr.msk.bf16.vlgmr.msra.gmra.mrb[8].mxu0 %vm691_vm1, %v800_v36 }
 0x221   : > { %2737 = vmatprep.mubr.msk.bf16.mxu0 %vm3225_vm0, %v3224_v51 }
 0x222   : > { %v867_v53 = vpop.permute.xlu1 %866 }
 0x223   : > { %2732 = vmatmul.mubr.msk.bf16.vlgmr.msra.gmra.mrb[8].mxu1 %vm691_vm1, %v867_v53 }
 0x224   : > { %2743 = vmatprep.mubr.msk.bf16.mxu1 %vm3225_vm0, %v3224_v51 }
 0x280   : > { %v732_v44 = vpop.f32.mrb[4].mxu0 }
 0x281   : > { %v2715_v45 = vpop.f32.mrb[5].mxu0  ;;  %v739_v2 = vsel %vm738_vm2, %v732_v44, -inf }
 0x282   : > { %v735_v46 = vpop.f32.mrb[6].mxu0 }
 0x283   : > { %v2716_v47 = vpop.f32.mrb[7].mxu0  ;;  %v790_v59 = vpop.f32.mrb[4].mxu1 }
 0x284   : > { %v797_v60 = vpack.c.bf16 %v790_v59, %v790_v59  ;;  %v2721_v61 = vpop.f32.mrb[5].mxu1 }
 0x285   : > { %v793_v62 = vpop.f32.mrb[6].mxu1 }
 0x286   : > { %v964_v63 = vsel %vm916_vm3, %v797_v60, 0  ;;  %v2722_v1 = vpop.f32.mrb[7].mxu1 }
 0x287   : > { %2742 = vmatpush3.bf16.msra.mxu1 %v964_v63 }
 0x288   : > { %2753 = vmatprep.subr.bf16.mxu1 %v3224_v51 }
 0x2f3   : > { %v844_v54 = vpop.f32.mrb[8].mxu0 }
 0x2f4   : > { %v2727_v55 = vpop.f32.mrb[9].mxu0  ;;  %v850_v56 = vsel %vm738_vm2, %v844_v54, -inf }
 0x2f5   : > { %851 = vmax.xlane.f32.xlu1 %v850_v56  ;;  %v847_v57 = vpop.f32.mrb[10].mxu0 }
 0x2f6   : > { %v2728_v58 = vpop.f32.mrb[11].mxu0  ;;  %v905_v8 = vpop.f32.mrb[8].mxu1 }
 0x2f7   : > { %v912_v9 = vpack.c.bf16 %v905_v8, %v905_v8  ;;  %v2733_v10 = vpop.f32.mrb[9].mxu1 }
 0x2f8   : > { %v908_v11 = vpop.f32.mrb[10].mxu1 }
 0x2f9   : > { %v918_v12 = vsel %vm916_vm3, %v912_v9, 0  ;;  %v2734_v13 = vpop.f32.mrb[11].mxu1 }
 0x2fa   : > { %2736 = vmatpush3.bf16.msra.mxu0 %v918_v12 }
 0x2fb   : > { %2747 = vmatprep.subr.bf16.mxu0 %v3224_v51 }
 0x306   : > { %1006 = vrot.lane.b32.xlu1 %v3574_v29, %s3227_s16 }
 0x32a   : > { %740 = vmax.xlane.f32.xlu1 %v739_v2 }
 0x33b   : > { %1167 = vrot.lane.b32.xlu1 %v3569_v27, %s3228_s12 }
 0x33f   : > { %1165 = vrot.lane.b32.xlu1 %v3574_v29, %s3228_s12 }
 0x382   : > { %v852_v3 = vpop.xlane.xlu1 %851 }
 0x383   : > { %v853_v4 = vsub.f32 %v844_v54, %v852_v3 }
 0x385   : > { %v854_v5 = vmul.f32 1.442695, %v853_v4 }
 0x386   : > { %v1007_v16 = vpop.permute.xlu1 %1006 }
 0x387   : > { %2958 = vpow2.f32 %v854_v5 }
 0x391   : > { %v2959_v6 = vpop.eup %2958 }
 0x392   : > { %v856_v7 = vsel %vm738_vm2, %v2959_v6, 0.0 }
 0x393   : > { %857 = vadd.xlane.f32.xlu0 %v856_v7 }
 0x3a9   : > { %1008 = vrot.lane.b32.xlu0 %v3569_v27, %s3227_s16 }
 0x3b7   : > { %v741_v18 = vpop.xlane.xlu1 %740 }
 0x3b8   : > { %v742_v19 = vsub.f32 %v732_v44, %v741_v18  ;;  %v1228_v18 = vld [vmem:[#allocation7 + $0x38] sm:$0xff] }
 0x3ba   : > { %v743_v20 = vmul.f32 1.442695, %v742_v19 }
 0x3bb   : > { %v1168_v39 = vpop.permute.xlu1 %1167 }
 0x3bc   : > { %2960 = vpow2.f32 %v743_v20  ;;  %v1173_v41 = vsel %vm691_vm1, %v1168_v39, 0 }
 0x3bf   : > { %v1166_v43 = vpop.permute.xlu1 %1165 }
 0x3c6   : > { %v2961_v21 = vpop.eup %2960 }
 0x3c7   : > { %v745_v22 = vsel %vm738_vm2, %v2961_v21, 0.0 }
 0x3c8   : > { %746 = vadd.xlane.f32.xlu0 %v745_v22 }
 0x3de   : > { %1071 = vrot.lane.b32.xlu0 %v3591_v42, %s3227_s16  ;;  %s2587_s16 = sshll.u32 %s3325_s14, 7  ;;  %s3233_s14 = smov [#allocation11]  }
 0x420   : > { %v858_v23 = vpop.xlane.xlu0 %857 }
 0x421   : > { %2962 = vrcp.f32 %v858_v23 }
 0x424   : > { %v1009_v26 = vpop.permute.xlu0 %1008 }
 0x425   : > { %v1014_v30 = vsel %vm691_vm1, %v1009_v26, 0 }
 0x42b   : > { %v2963_v24 = vpop.eup %2962 }
 0x42c   : > { %v860_v25 = vmul.f32 %v2963_v24, %v2959_v6 }
 0x42e   : > { %v911_v28 = vpack.c.bf16 %v860_v25, %v860_v25 }
 0x430   : > { %2738 = vmatmul.mubr.msk.bf16.vlgmr.msra.gmra.mrb[12].mxu0 %vm738_vm2, %v911_v28 }
 0x431   : > { %2748 = vmatpush3.bf16.xpose.msra.mxu0 %v1014_v30  ;;  %2749 = vmatprep.mubr.msk.bf16.mxu0 %vm3225_vm0, %v3224_v51 }
 0x432   : > { %2759 = vmatprep.subr.bf16.mxu0 %v3224_v51 }
 0x438   : > { %2750 = vmatmul.mubr.msk.bf16.vlgmr.msra.gmra.mrb[16].mxu0 %vm691_vm1, %v1007_v16  ;;  %v1227_v16 = vld [vmem:[#allocation7 + $0x30] sm:$0xff] }
 0x439   : > { %2761 = vmatprep.mubr.msk.bf16.mxu0 %vm3225_vm0, %v3224_v51 }
 0x455   : > { %v747_v31 = vpop.xlane.xlu0 %746 }
 0x456   : > { %2964 = vrcp.f32 %v747_v31 }
 0x459   : > { %v1072_v40 = vpop.permute.xlu0 %1071 }
 0x460   : > { %v2965_v34 = vpop.eup %2964 }
 0x461   : > { %v749_v36 = vmul.f32 %v2965_v34, %v2961_v21  ;;  %v1229_v21 = vpack.c.bf16 %v1228_v18, %v1227_v16 }
 0x463   : > { %v796_v38 = vpack.c.bf16 %v749_v36, %v749_v36 }
 0x465   : > { %2744 = vmatmul.mubr.msk.bf16.vlgmr.msra.gmra.mrb[12].mxu1 %vm738_vm2, %v796_v38 }
 0x466   : > { %2754 = vmatpush3.bf16.msra.mxu1 %v1070_v37  ;;  %2755 = vmatprep.mubr.msk.bf16.mxu1 %vm3225_vm0, %v3224_v51 }
 0x467   : > { %2765 = vmatprep.subr.bf16.mxu1 %v3224_v51 }
 0x46d   : > { %2756 = vmatmul.mubr.msk.bf16.vlgmr.msra.gmra.mrb[16].mxu1 %vm691_vm1, %v1072_v40 }
 0x46e   : > { %2767 = vmatprep.mubr.msk.bf16.mxu1 %vm3225_vm0, %v3224_v51 }
 0x46f   : > { %2766 = vmatpush3.bf16.xpose.msra.mxu1 %v1173_v41 }
 0x470   : > { %2777 = vmatprep.subr.bf16.mxu1 %v3224_v51 }
 0x476   : > { %2768 = vmatmul.mubr.msk.bf16.vlgmr.msra.gmra.mrb[20].mxu1 %vm691_vm1, %v1166_v43 }
 0x477   : > { %2779 = vmatprep.mubr.msk.bf16.mxu1 %vm3225_vm0, %v3224_v51 }
 0x503   : > { %v954_v44 = vpop.f32.mrb[12].mxu0 }
 0x504   : > { %v2739_v45 = vpop.f32.mrb[13].mxu0 }
 0x505   : > { %v957_v46 = vpop.f32.mrb[14].mxu0 }
 0x506   : > { %v2740_v47 = vpop.f32.mrb[15].mxu0 }
 0x507   : > { %v1386_v47 = vld [vmem:[#allocation7 + $0x40] sm:$0xff] }
 0x50b   : > { %v1050_v48 = vpop.f32.mrb[16].mxu0 }
 0x50c   : > { %v2751_v50 = vpop.f32.mrb[17].mxu0  ;;  %v1056_v52 = vsel %vm738_vm2, %v1050_v48, -inf }
 0x50d   : > { %1057 = vmax.xlane.f32.xlu0 %v1056_v52  ;;  %v1053_v53 = vpop.f32.mrb[18].mxu0 }
 0x50e   : > { %v2752_v54 = vpop.f32.mrb[19].mxu0 }
 0x523   : > { %1230 = vrot.lane.b32.xlu0 %v3591_v42, %s3228_s12  ;;  %s513_s12 = scalar_lea.vmem [#allocation11], %s2550_s30  ;;  %s3140_s30 = sshll.u32 %s3233_s14, 4  ;;  %s3141_s30 = int_to_ptr.vmem [resolvable:$false] %s3140_s30 }
 0x527   : > { %1324 = vrot.lane.b32.xlu0 %v3574_v29, %s3229_s13 }
 0x538   : > { %v1000_v55 = vpop.f32.mrb[12].mxu1 }
 0x539   : > { %v1001_v56 = vadd.f32 %v1000_v55, %v954_v44  ;;  %v2745_v57 = vpop.f32.mrb[13].mxu1 }
 0x53a   : > { %v1003_v58 = vpop.f32.mrb[14].mxu1 }
 0x53b   : > { %v2746_v59 = vpop.f32.mrb[15].mxu1 }
 0x540   : > { %v1110_v60 = vpop.f32.mrb[16].mxu1 }
 0x541   : > { %v1117_v61 = vpack.c.bf16 %v1110_v60, %v1110_v60  ;;  %v2757_v62 = vpop.f32.mrb[17].mxu1 }
 0x542   : > { %v1113_v63 = vpop.f32.mrb[18].mxu1 }
 0x543   : > { %v1122_v1 = vsel %vm916_vm3, %v1117_v61, 0  ;;  %v2758_v2 = vpop.f32.mrb[19].mxu1 }
 0x544   : > { %2760 = vmatpush3.bf16.msra.mxu0 %v1122_v1 }
 0x545   : > { %2771 = vmatprep.subr.bf16.mxu0 %v3224_v51 }
 0x549   : > { %v1209_v3 = vpop.f32.mrb[20].mxu1 }
 0x54a   : > { %v2769_v4 = vpop.f32.mrb[21].mxu1  ;;  %v1215_v12 = vsel %vm738_vm2, %v1209_v3, -inf }
 0x54b   : > { %v1212_v5 = vpop.f32.mrb[22].mxu1 }
 0x54c   : > { %v2770_v6 = vpop.f32.mrb[23].mxu1 }
 0x59a   : > { %v1058_v7 = vpop.xlane.xlu0 %1057 }
 0x59b   : > { %v1059_v8 = vsub.f32 %v1050_v48, %v1058_v7  ;;  %v1387_v48 = vld [vmem:[#allocation7 + $0x48] sm:$0xff] }
 0x59c   : > { %v1388_v54 = vpack.c.bf16 %v1387_v48, %v1386_v47 }
 0x59d   : > { %v1060_v9 = vmul.f32 1.442695, %v1059_v8 }
 0x59e   : > { %v1231_v24 = vpop.permute.xlu0 %1230 }
 0x59f   : > { %2966 = vpow2.f32 %v1060_v9 }
 0x5a2   : > { %v1325_v26 = vpop.permute.xlu0 %1324 }
 0x5a9   : > { %v2967_v10 = vpop.eup %2966 }
 0x5aa   : > { %v1062_v11 = vsel %vm738_vm2, %v2967_v10, 0.0 }
 0x5ab   : > { %1063 = vadd.xlane.f32.xlu1 %v1062_v11 }
 0x5bc   : > { %1326 = vrot.lane.b32.xlu1 %v3569_v27, %s3229_s13 }
 0x5e0   : > { %1216 = vmax.xlane.f32.xlu1 %v1215_v12 }
 0x5f1   : > { %1485 = vrot.lane.b32.xlu1 %v3569_v27, %s3230_s10 }
 0x5f5   : > { %1483 = vrot.lane.b32.xlu1 %v3574_v29, %s3230_s10 }
 0x638   : > { %v1064_v13 = vpop.xlane.xlu1 %1063 }
 0x639   : > { %2968 = vrcp.f32 %v1064_v13 }
 0x63c   : > { %v1327_v23 = vpop.permute.xlu1 %1326 }
 0x63d   : > { %v1332_v25 = vsel %vm691_vm1, %v1327_v23, 0 }
 0x643   : > { %v2969_v19 = vpop.eup %2968 }
 0x644   : > { %v1066_v20 = vmul.f32 %v2969_v19, %v2967_v10 }
 0x646   : > { %v1116_v22 = vpack.c.bf16 %v1066_v20, %v1066_v20 }
 0x648   : > { %2762 = vmatmul.mubr.msk.bf16.vlgmr.msra.gmra.mrb[20].mxu0 %vm738_vm2, %v1116_v22 }
 0x649   : > { %2772 = vmatpush3.bf16.msra.mxu0 %v1229_v21  ;;  %2773 = vmatprep.mubr.msk.bf16.mxu0 %vm3225_vm0, %v3224_v51 }
 0x64a   : > { %2783 = vmatprep.subr.bf16.mxu0 %v3224_v51 }
 0x650   : > { %2774 = vmatmul.mubr.msk.bf16.vlgmr.msra.gmra.mrb[24].mxu0 %vm691_vm1, %v1231_v24 }
 0x651   : > { %2785 = vmatprep.mubr.msk.bf16.mxu0 %vm3225_vm0, %v3224_v51 }
 0x652   : > { %2784 = vmatpush3.bf16.xpose.msra.mxu0 %v1332_v25 }
 0x653   : > { %2795 = vmatprep.subr.bf16.mxu0 %v3224_v51 }
 0x659   : > { %2786 = vmatmul.mubr.msk.bf16.vlgmr.msra.gmra.mrb[28].mxu0 %vm691_vm1, %v1325_v26 }
 0x65a   : > { %2797 = vmatprep.mubr.msk.bf16.mxu0 %vm3225_vm0, %v3224_v51 }
 0x66d   : > { %v1217_v28 = vpop.xlane.xlu1 %1216 }
 0x66e   : > { %v1218_v30 = vsub.f32 %v1209_v3, %v1217_v28  ;;  %v1545_v28 = vld [vmem:[#allocation7 + $0x50] sm:$0xff] }
 0x670   : > { %v1219_v31 = vmul.f32 1.442695, %v1218_v30  ;;  %v1546_v30 = vld [vmem:[#allocation7 + $0x58] sm:$0xff] }
 0x671   : > { %v1486_v61 = vpop.permute.xlu1 %1485 }
 0x672   : > { %2970 = vpow2.f32 %v1219_v31  ;;  %v1491_v63 = vsel %vm691_vm1, %v1486_v61, 0 }
 0x675   : > { %v1484_v1 = vpop.permute.xlu1 %1483 }
 0x67c   : > { %v2971_v32 = vpop.eup %2970 }
 0x67d   : > { %v1221_v33 = vsel %vm738_vm2, %v2971_v32, 0.0 }
 0x67e   : > { %1222 = vadd.xlane.f32.xlu0 %v1221_v33  ;;  %v1547_v33 = vpack.c.bf16 %v1546_v30, %v1545_v28 }
 0x694   : > { %1389 = vrot.lane.b32.xlu0 %v3591_v42, %s3229_s13  ;;  %s3874_s13 = sld [smem:[#allocation18_spill]] }
 0x70b   : > { %v1223_v34 = vpop.xlane.xlu0 %1222 }
 0x70c   : > { %2972 = vrcp.f32 %v1223_v34 }
 0x70f   : > { %v1390_v62 = vpop.permute.xlu0 %1389 }
 0x716   : > { %v2973_v41 = vpop.eup %2972 }
 0x717   : > { %v1225_v44 = vmul.f32 %v2973_v41, %v2971_v32 }
 0x719   : > { %v1275_v55 = vpack.c.bf16 %v1225_v44, %v1225_v44 }
 0x71b   : > { %v1158_v36 = vpop.f32.mrb[20].mxu0 }
 0x71c   : > { %v1164_v37 = vadd.f32 %v1158_v36, %v1001_v56  ;;  %v2763_v38 = vpop.f32.mrb[21].mxu0 }
 0x71d   : > { %v1161_v39 = vpop.f32.mrb[22].mxu0 }
 0x71e   : > { %v2764_v40 = vpop.f32.mrb[23].mxu0 }
 0x723   : > { %v1269_v43 = vpop.f32.mrb[24].mxu0 }
 0x724   : > { %v1276_v45 = vpack.c.bf16 %v1269_v43, %v1269_v43  ;;  %v2775_v46 = vpop.f32.mrb[25].mxu0 }
 0x725   : > { %v1272_v50 = vpop.f32.mrb[26].mxu0 }
 0x726   : > { %v1281_v52 = vsel %vm916_vm3, %v1276_v45, 0  ;;  %v2776_v53 = vpop.f32.mrb[27].mxu0 }
 0x727   : > { %2778 = vmatpush3.bf16.msra.mxu1 %v1281_v52 }
 0x728   : > { %2789 = vmatprep.subr.bf16.mxu1 %v3224_v51 }
 0x72a   : > { %2780 = vmatmul.mubr.msk.bf16.vlgmr.msra.gmra.mrb[24].mxu1 %vm738_vm2, %v1275_v55  ;;  %v1704_v55 = vld [vmem:[#allocation7 + $0x60] sm:$0xff] }
 0x72b   : > { %2790 = vmatpush3.bf16.msra.mxu1 %v1388_v54  ;;  %2791 = vmatprep.mubr.msk.bf16.mxu1 %vm3225_vm0, %v3224_v51 }
 0x72c   : > { %v1368_v56 = vpop.f32.mrb[28].mxu0  ;;  %2801 = vmatprep.subr.bf16.mxu1 %v3224_v51 }
 0x72d   : > { %v2787_v57 = vpop.f32.mrb[29].mxu0  ;;  %v1374_v58 = vsel %vm738_vm2, %v1368_v56, -inf }
 0x72e   : > { %1375 = vmax.xlane.f32.xlu0 %v1374_v58  ;;  %v1371_v59 = vpop.f32.mrb[30].mxu0 }
 0x72f   : > { %v2788_v60 = vpop.f32.mrb[31].mxu0 }
 0x732   : > { %2792 = vmatmul.mubr.msk.bf16.vlgmr.msra.gmra.mrb[28].mxu1 %vm691_vm1, %v1390_v62 }
 0x733   : > { %2803 = vmatprep.mubr.msk.bf16.mxu1 %vm3225_vm0, %v3224_v51 }
 0x734   : > { %2802 = vmatpush3.bf16.xpose.msra.mxu1 %v1491_v63 }
 0x735   : > { %2813 = vmatprep.subr.bf16.mxu1 %v3224_v51 }
 0x73b   : > { %2804 = vmatmul.mubr.msk.bf16.vlgmr.msra.gmra.mrb[32].mxu1 %vm691_vm1, %v1484_v1 }
 0x73c   : > { %2815 = vmatprep.mubr.msk.bf16.mxu1 %vm3225_vm0, %v3224_v51 }
 0x744   : > { %1548 = vrot.lane.b32.xlu0 %v3591_v42, %s3230_s10 }
 0x748   : > { %1642 = vrot.lane.b32.xlu0 %v3574_v29, %s3231_s11 }
 0x7bb   : > { %v1376_v2 = vpop.xlane.xlu0 %1375 }
 0x7bc   : > { %v1377_v3 = vsub.f32 %v1368_v56, %v1376_v2  ;;  %v1705_v56 = vld [vmem:[#allocation7 + $0x68] sm:$0xff] }
 0x7bd   : > { %v1706_v62 = vpack.c.bf16 %v1705_v56, %v1704_v55 }
 0x7be   : > { %v1378_v4 = vmul.f32 1.442695, %v1377_v3 }
 0x7bf   : > { %v1549_v36 = vpop.permute.xlu0 %1548 }
 0x7c0   : > { %2974 = vpow2.f32 %v1378_v4 }
 0x7ca   : > { %v2975_v5 = vpop.eup %2974 }
 0x7cb   : > { %v1380_v6 = vsel %vm738_vm2, %v2975_v5, 0.0 }
 0x7cc   : > { %1381 = vadd.xlane.f32.xlu1 %v1380_v6 }
 0x7dd   : > { %1644 = vrot.lane.b32.xlu1 %v3569_v27, %s3231_s11 }
 0x7fd   : > { %v1317_v7 = vpop.f32.mrb[24].mxu1 }
 0x7fe   : > { %v1323_v8 = vadd.f32 %v1317_v7, %v1164_v37  ;;  %v2781_v9 = vpop.f32.mrb[25].mxu1  ;;  %v1643_v37 = vpop.permute.xlu0 %1642 }
 0x7ff   : > { %v1320_v10 = vpop.f32.mrb[26].mxu1 }
 0x800   : > { %v2782_v11 = vpop.f32.mrb[27].mxu1 }
 0x805   : > { %v1428_v12 = vpop.f32.mrb[28].mxu1 }
 0x806   : > { %v1435_v13 = vpack.c.bf16 %v1428_v12, %v1428_v12  ;;  %v2793_v16 = vpop.f32.mrb[29].mxu1 }
 0x807   : > { %v1431_v18 = vpop.f32.mrb[30].mxu1 }
 0x808   : > { %v1440_v19 = vsel %vm916_vm3, %v1435_v13, 0  ;;  %v2794_v20 = vpop.f32.mrb[31].mxu1 }
 0x809   : > { %2796 = vmatpush3.bf16.msra.mxu0 %v1440_v19 }
 0x80a   : > { %2807 = vmatprep.subr.bf16.mxu0 %v3224_v51 }
 0x80e   : > { %v1527_v21 = vpop.f32.mrb[32].mxu1 }
 0x80f   : > { %v2805_v22 = vpop.f32.mrb[33].mxu1  ;;  %v1533_v23 = vsel %vm738_vm2, %v1527_v21, -inf }
 0x810   : > { %v1530_v24 = vpop.f32.mrb[34].mxu1  ;;  %1534 = vmax.xlane.f32.xlu1 %v1533_v23 }
 0x811   : > { %v2806_v25 = vpop.f32.mrb[35].mxu1 }
 0x821   : > { %1803 = vrot.lane.b32.xlu1 %v3569_v27, %s3232_s19 }
 0x825   : > { %1801 = vrot.lane.b32.xlu1 %v3574_v29, %s3232_s19 }
 0x859   : > { %v1382_v26 = vpop.xlane.xlu1 %1381 }
 0x85a   : > { %2976 = vrcp.f32 %v1382_v26 }
 0x85d   : > { %v1645_v27 = vpop.permute.xlu1 %1644 }
 0x85e   : > { %v1650_v29 = vsel %vm691_vm1, %v1645_v27, 0 }
 0x864   : > { %v2977_v31 = vpop.eup %2976 }
 0x865   : > { %v1384_v32 = vmul.f32 %v2977_v31, %v2975_v5 }
 0x867   : > { %v1434_v34 = vpack.c.bf16 %v1384_v32, %v1384_v32 }
 0x869   : > { %2798 = vmatmul.mubr.msk.bf16.vlgmr.msra.gmra.mrb[32].mxu0 %vm738_vm2, %v1434_v34 }
 0x86a   : > { %2808 = vmatpush3.bf16.msra.mxu0 %v1547_v33  ;;  %2809 = vmatprep.mubr.msk.bf16.mxu0 %vm3225_vm0, %v3224_v51 }
 0x86b   : > { %2819 = vmatprep.subr.bf16.mxu0 %v3224_v51 }
 0x871   : > { %2810 = vmatmul.mubr.msk.bf16.vlgmr.msra.gmra.mrb[36].mxu0 %vm691_vm1, %v1549_v36  ;;  %v1863_v36 = vld [vmem:[#allocation7 + $0x70] sm:$0xff] }
 0x872   : > { %2821 = vmatprep.mubr.msk.bf16.mxu0 %vm3225_vm0, %v3224_v51 }
 0x873   : > { %2820 = vmatpush3.bf16.xpose.msra.mxu0 %v1650_v29  ;;  %v1864_v29 = vld [vmem:[#allocation7 + $0x78] sm:$0xff] }
 0x874   : > { %2831 = vmatprep.subr.bf16.mxu0 %v3224_v51 }
 0x87a   : > { %2822 = vmatmul.mubr.msk.bf16.vlgmr.msra.gmra.mrb[40].mxu0 %vm691_vm1, %v1643_v37 }
 0x87b   : > { %2833 = vmatprep.mubr.msk.bf16.mxu0 %vm3225_vm0, %v3224_v51 }
 0x89d   : > { %v1535_v38 = vpop.xlane.xlu1 %1534 }
 0x89e   : > { %v1536_v39 = vsub.f32 %v1527_v21, %v1535_v38 }
 0x8a0   : > { %v1537_v40 = vmul.f32 1.442695, %v1536_v39  ;;  %v1865_v39 = vpack.c.bf16 %v1864_v29, %v1863_v36 }
 0x8a1   : > { %v1804_v6 = vpop.permute.xlu1 %1803 }
 0x8a2   : > { %2978 = vpow2.f32 %v1537_v40 }
 0x8a5   : > { %v1802_v9 = vpop.permute.xlu1 %1801 }
 0x8ac   : > { %v2979_v41 = vpop.eup %2978 }
 0x8ad   : > { %v1539_v43 = vsel %vm738_vm2, %v2979_v41, 0.0 }
 0x8ae   : > { %1540 = vadd.xlane.f32.xlu0 %v1539_v43 }
 0x8c4   : > { %1707 = vrot.lane.b32.xlu0 %v3591_v42, %s3231_s11 }
 0x93b   : > { %v1541_v44 = vpop.xlane.xlu0 %1540 }
 0x93c   : > { %2980 = vrcp.f32 %v1541_v44  ;;  %v1476_v45 = vpop.f32.mrb[32].mxu0 }
 0x93d   : > { %v1482_v46 = vadd.f32 %v1476_v45, %v1323_v8  ;;  %v2799_v47 = vpop.f32.mrb[33].mxu0  ;;  %v1809_v8 = vsel %vm691_vm1, %v1804_v6, 0 }
 0x93e   : > { %v1479_v48 = vpop.f32.mrb[34].mxu0 }
 0x93f   : > { %v2800_v50 = vpop.f32.mrb[35].mxu0  ;;  %v1708_v7 = vpop.permute.xlu0 %1707 }
 0x944   : > { %v1587_v52 = vpop.f32.mrb[36].mxu0 }
 0x945   : > { %v1594_v53 = vpack.c.bf16 %v1587_v52, %v1587_v52  ;;  %v2811_v54 = vpop.f32.mrb[37].mxu0 }
 0x946   : > { %v2981_v57 = vpop.eup %2980  ;;  %v1590_v58 = vpop.f32.mrb[38].mxu0 }
 0x947   : > { %v1543_v59 = vmul.f32 %v2981_v57, %v2979_v41  ;;  %v1599_v60 = vsel %vm916_vm3, %v1594_v53, 0  ;;  %v2812_v61 = vpop.f32.mrb[39].mxu0 }
 0x948   : > { %2814 = vmatpush3.bf16.msra.mxu1 %v1599_v60 }
 0x949   : > { %2825 = vmatprep.subr.bf16.mxu1 %v3224_v51  ;;  %v1593_v63 = vpack.c.bf16 %v1543_v59, %v1543_v59 }
 0x94b   : > { %2816 = vmatmul.mubr.msk.bf16.vlgmr.msra.gmra.mrb[36].mxu1 %vm738_vm2, %v1593_v63 }
 0x94c   : > { %2826 = vmatpush3.bf16.msra.mxu1 %v1706_v62  ;;  %2827 = vmatprep.mubr.msk.bf16.mxu1 %vm3225_vm0, %v3224_v51 }
 0x94d   : > { %v1686_v1 = vpop.f32.mrb[40].mxu0  ;;  %2837 = vmatprep.subr.bf16.mxu1 %v3224_v51 }
 0x94e   : > { %v2823_v2 = vpop.f32.mrb[41].mxu0  ;;  %v1692_v3 = vsel %vm738_vm2, %v1686_v1, -inf }
 0x94f   : > { %1693 = vmax.xlane.f32.xlu0 %v1692_v3  ;;  %v1689_v4 = vpop.f32.mrb[42].mxu0  ;;  %v2580_v2 = vld [vmem:[%s3837_s4] ss:$0 sm:$0xff] }
 0x950   : > { %v2824_v5 = vpop.f32.mrb[43].mxu0 }
 0x953   : > { %2828 = vmatmul.mubr.msk.bf16.vlgmr.msra.gmra.mrb[40].mxu1 %vm691_vm1, %v1708_v7 }
 0x954   : > { %2839 = vmatprep.mubr.msk.bf16.mxu1 %vm3225_vm0, %v3224_v51 }
 0x955   : > { %2838 = vmatpush3.bf16.xpose.msra.mxu1 %v1809_v8 }
 0x956   : > { %2849 = vmatprep.subr.bf16.mxu1 %v3224_v51 }
 0x95c   : > { %2840 = vmatmul.mubr.msk.bf16.vlgmr.msra.gmra.mrb[44].mxu1 %vm691_vm1, %v1802_v9  ;;  %v1999_v9 = vld [vmem:[#allocation8 + $0x8] sm:$0xff] }
 0x95d   : > { %2851 = vmatprep.mubr.msk.bf16.mxu1 %vm3225_vm0, %v3224_v51 }
 0x965   : > { %1866 = vrot.lane.b32.xlu0 %v3591_v42, %s3232_s19  ;;  %s3875_s19 = sld [smem:[#allocation19_spill]] }
 0x9dc   : > { %v1694_v10 = vpop.xlane.xlu0 %1693 }
 0x9dd   : > { %v1695_v11 = vsub.f32 %v1686_v1, %v1694_v10  ;;  %v2003_v10 = vld [vmem:[#allocation8 + $0x28] sm:$0xff] }
 0x9df   : > { %v1696_v12 = vmul.f32 1.442695, %v1695_v11  ;;  %v2001_v11 = vld [vmem:[#allocation8 + $0x18] sm:$0xff] }
 0x9e0   : > { %v1867_v41 = vpop.permute.xlu0 %1866 }
 0x9e1   : > { %2982 = vpow2.f32 %v1696_v12  ;;  %v2063_v12 = vpack.c.bf16 %v2003_v10, %v1999_v9  ;;  %v2032_v10 = vld [vmem:[#allocation8 + $0x110] sm:$0xff] }
 0x9eb   : > { %v2983_v13 = vpop.eup %2982 }
 0x9ec   : > { %v1698_v16 = vsel %vm738_vm2, %v2983_v13, 0.0 }
 0x9ed   : > { %1699 = vadd.xlane.f32.xlu1 %v1698_v16  ;;  %v1998_v16 = vld [vmem:[#allocation8] sm:$0xff] }
 0xa1e   : > { %v1635_v18 = vpop.f32.mrb[36].mxu1 }
 0xa1f   : > { %v1641_v19 = vadd.f32 %v1635_v18, %v1482_v46  ;;  %v2817_v20 = vpop.f32.mrb[37].mxu1 }
 0xa20   : > { %v1638_v21 = vpop.f32.mrb[38].mxu1  ;;  %v2000_v20 = vld [vmem:[#allocation8 + $0x10] sm:$0xff] }
 0xa21   : > { %v2818_v22 = vpop.f32.mrb[39].mxu1  ;;  %v2004_v21 = vld [vmem:[#allocation8 + $0x30] sm:$0xff] }
 0xa22   : > { %v2007_v22 = vld [vmem:[#allocation8 + $0x48] sm:$0xff] }
 0xa26   : > { %v1746_v23 = vpop.f32.mrb[40].mxu1 }
 0xa27   : > { %v1753_v24 = vpack.c.bf16 %v1746_v23, %v1746_v23  ;;  %v2829_v25 = vpop.f32.mrb[41].mxu1  ;;  %v2064_v23 = vpack.c.bf16 %v2004_v21, %v2000_v20  ;;  %v2038_v20 = vld [vmem:[#allocation8 + $0x140] sm:$0xff] }
 0xa28   : > { %v1749_v26 = vpop.f32.mrb[42].mxu1  ;;  %v2009_v25 = vld [vmem:[#allocation8 + $0x58] sm:$0xff]  ;;  %v2042_v21 = vld [vmem:[#allocation8 + $0x160] sm:$0xff] }
 0xa29   : > { %v1758_v28 = vsel %vm916_vm3, %v1753_v24, 0  ;;  %v2830_v42 = vpop.f32.mrb[43].mxu1  ;;  %v2011_v24 = vld [vmem:[#allocation8 + $0x68] sm:$0xff]  ;;  %v2013_v26 = vld [vmem:[#allocation8 + $0x78] sm:$0xff] }
 0xa2a   : > { %2832 = vmatpush3.bf16.msra.mxu0 %v1758_v28  ;;  %v2069_v28 = vpack.c.bf16 %v2013_v26, %v2009_v25  ;;  %v2006_v42 = vld [vmem:[#allocation8 + $0x40] sm:$0xff]  ;;  %v2044_v25 = vld [vmem:[#allocation8 + $0x170] sm:$0xff] }
 0xa2b   : > { %2843 = vmatprep.subr.bf16.mxu0 %v3224_v51 }
 0xa2f   : > { %v1845_v30 = vpop.f32.mrb[44].mxu1 }
 0xa30   : > { %v2841_v31 = vpop.f32.mrb[45].mxu1  ;;  %v1851_v32 = vsel %vm738_vm2, %v1845_v30, -inf }
 0xa31   : > { %v1848_v33 = vpop.f32.mrb[46].mxu1  ;;  %1852 = vmax.xlane.f32.xlu1 %v1851_v32  ;;  %v2008_v31 = vld [vmem:[#allocation8 + $0x50] sm:$0xff] }
 0xa32   : > { %v2842_v34 = vpop.f32.mrb[47].mxu1  ;;  %v2012_v33 = vld [vmem:[#allocation8 + $0x70] sm:$0xff] }
 0xa33   : > { %v2015_v34 = vld [vmem:[#allocation8 + $0x88] sm:$0xff]  ;;  %v2068_v36 = vpack.c.bf16 %v2012_v33, %v2008_v31  ;;  %v2053_v31 = vld [vmem:[#allocation8 + $0x1b8] sm:$0xff]  ;;  %v2050_v33 = vld [vmem:[#allocation8 + $0x1a0] sm:$0xff] }
 0xa7a   : > { %v1700_v27 = vpop.xlane.xlu1 %1699 }
 0xa7b   : > { %2984 = vrcp.f32 %v1700_v27  ;;  %v2019_v27 = vld [vmem:[#allocation8 + $0xa8] sm:$0xff] }
 0xa7c   : > { %v2071_v29 = vpack.c.bf16 %v2019_v27, %v2015_v34 }
 0xa85   : > { %v2985_v37 = vpop.eup %2984 }
 0xa86   : > { %v1702_v38 = vmul.f32 %v2985_v37, %v2983_v13  ;;  %v2005_v13 = vld [vmem:[#allocation8 + $0x38] sm:$0xff] }
 0xa87   : > { %v2065_v18 = vpack.c.bf16 %v2005_v13, %v2001_v11  ;;  %v2017_v37 = vld [vmem:[#allocation8 + $0x98] sm:$0xff]  ;;  %v2036_v11 = vld [vmem:[#allocation8 + $0x130] sm:$0xff]  ;;  %v2039_v13 = vld [vmem:[#allocation8 + $0x148] sm:$0xff] }
 0xa88   : > { %v1752_v40 = vpack.c.bf16 %v1702_v38, %v1702_v38  ;;  %v2021_v38 = vld [vmem:[#allocation8 + $0xb8] sm:$0xff] }
 0xa8a   : > { %2834 = vmatmul.mubr.msk.bf16.vlgmr.msra.gmra.mrb[44].mxu0 %vm738_vm2, %v1752_v40 }
 0xa8b   : > { %2844 = vmatpush3.bf16.msra.mxu0 %v1865_v39  ;;  %2845 = vmatprep.mubr.msk.bf16.mxu0 %vm3225_vm0, %v3224_v51  ;;  %v2073_v39 = vpack.c.bf16 %v2021_v38, %v2017_v37  ;;  %v2055_v37 = vld [vmem:[#allocation8 + $0x1c8] sm:$0xff] }
 0xa8c   : > { %2116 = vmatprep.subr.bf16.mxu0 %v2063_v12  ;;  %v2080_v12 = vpack.c.bf16 %v2036_v11, %v2032_v10  ;;  %v2256_v10 = vld [vmem:[#allocation10 + $0x190] sm:$0xff]  ;;  %v2257_v11 = vld [vmem:[#allocation10 + $0x198] sm:$0xff] }
 0xa92   : > { %2846 = vmatmul.mubr.msk.bf16.vlgmr.msra.gmra.mrb[48].mxu0 %vm691_vm1, %v1867_v41 }
 0xa93   : > { %2148 = vmatprep.mubr.bf16.mxu0 %v3223_v0 }
 0xabe   : > { %v1853_v43 = vpop.xlane.xlu1 %1852 }
 0xabf   : > { %v1854_v44 = vsub.f32 %v1845_v30, %v1853_v43  ;;  %v2010_v30 = vld [vmem:[#allocation8 + $0x60] sm:$0xff] }
 0xac0   : > { %v2066_v32 = vpack.c.bf16 %v2010_v30, %v2006_v42  ;;  %v2049_v42 = vld [vmem:[#allocation8 + $0x198] sm:$0xff] }
 0xac1   : > { %v1855_v45 = vmul.f32 1.442695, %v1854_v44  ;;  %v2089_v34 = vpack.c.bf16 %v2053_v31, %v2049_v42  ;;  %v2210_v42 = vld [vmem:[#allocation10 + $0x20] sm:$0xff] }
 0xac3   : > { %2986 = vpow2.f32 %v1855_v45  ;;  %v2014_v45 = vld [vmem:[#allocation8 + $0x80] sm:$0xff] }
 0xacd   : > { %v2987_v46 = vpop.eup %2986 }
 0xace   : > { %v1857_v47 = vsel %vm738_vm2, %v2987_v46, 0.0 }
 0xacf   : > { %1858 = vadd.xlane.f32.xlu1 %v1857_v47  ;;  %v2016_v47 = vld [vmem:[#allocation8 + $0x90] sm:$0xff] }
 0xb5c   : > { %v1859_v48 = vpop.xlane.xlu1 %1858 }
 0xb5d   : > { %2988 = vrcp.f32 %v1859_v48  ;;  %v1794_v50 = vpop.f32.mrb[44].mxu0 }
 0xb5e   : > { %v1800_v52 = vadd.f32 %v1794_v50, %v1641_v19  ;;  %v2835_v53 = vpop.f32.mrb[45].mxu0  ;;  %v2020_v50 = vld [vmem:[#allocation8 + $0xb0] sm:$0xff] }
 0xb5f   : > { %v1797_v54 = vpop.f32.mrb[46].mxu0  ;;  %v2023_v53 = vld [vmem:[#allocation8 + $0xc8] sm:$0xff] }
 0xb60   : > { %v2836_v51 = vpop.f32.mrb[47].mxu0  ;;  %v2027_v54 = vld [vmem:[#allocation8 + $0xe8] sm:$0xff] }
 0xb61   : > { %v2025_v51 = vld [vmem:[#allocation8 + $0xd8] sm:$0xff] }
 0xb65   : > { %v1905_v55 = vpop.f32.mrb[48].mxu0 }
 0xb66   : > { %v1912_v56 = vpack.c.bf16 %v1905_v55, %v1905_v55  ;;  %v2847_v57 = vpop.f32.mrb[49].mxu0  ;;  %v2075_v55 = vpack.c.bf16 %v2027_v54, %v2023_v53  ;;  %v2222_v54 = vld [vmem:[#allocation10 + $0x80] sm:$0xff] }
 0xb67   : > { %v2989_v58 = vpop.eup %2988  ;;  %v1908_v59 = vpop.f32.mrb[50].mxu0  ;;  %v2022_v57 = vld [vmem:[#allocation8 + $0xc0] sm:$0xff] }
 0xb68   : > { %v1861_v60 = vmul.f32 %v2989_v58, %v2987_v46  ;;  %v1917_v61 = vsel %vm916_vm3, %v1912_v56, 0  ;;  %v2848_v62 = vpop.f32.mrb[51].mxu0  ;;  %v2018_v46 = vld [vmem:[#allocation8 + $0xa0] sm:$0xff]  ;;  %v2029_v56 = vld [vmem:[#allocation8 + $0xf8] sm:$0xff] }
 0xb69   : > { %2850 = vmatpush3.bf16.msra.mxu1 %v1917_v61  ;;  %v2070_v48 = vpack.c.bf16 %v2018_v46, %v2014_v45  ;;  %v2026_v58 = vld [vmem:[#allocation8 + $0xe0] sm:$0xff]  ;;  %v2077_v59 = vpack.c.bf16 %v2029_v56, %v2025_v51  ;;  %v2024_v61 = vld [vmem:[#allocation8 + $0xd0] sm:$0xff]  ;;  %v2223_v51 = vld [vmem:[#allocation10 + $0x88] sm:$0xff] }
 0xb6a   : > { %v1911_v63 = vpack.c.bf16 %v1861_v60, %v1861_v60  ;;  %2157 = vmatprep.subr.bf16.mxu1 %v2065_v18  ;;  %v2074_v60 = vpack.c.bf16 %v2026_v58, %v2022_v57  ;;  %v2028_v62 = vld [vmem:[#allocation8 + $0xf0] sm:$0xff]  ;;  %v2054_v46 = vld [vmem:[#allocation8 + $0x1c0] sm:$0xff]  ;;  %v2278_v56 = vpack.c.bf16 %v2223_v51, %v2222_v54  ;;  %v2255_v57 = vld [vmem:[#allocation10 + $0x188] sm:$0xff] }
 0xb6c   : > { %2852 = vmatmul.mubr.msk.bf16.vlgmr.msra.gmra.mrb[48].mxu1 %vm738_vm2, %v1911_v63  ;;  %v2076_v63 = vpack.c.bf16 %v2028_v62, %v2024_v61 }
 0xb6d   : > { %2189 = vmatprep.mubr.bf16.mxu1 %v3223_v0  ;;  %v2002_v0 = vld [vmem:[#allocation8 + $0x20] sm:$0xff]  ;;  %2158 = vmatpush1.bf16.msra.mxu1 %v2064_v23  ;;  %v2082_v23 = vpack.c.bf16 %v2042_v21, %v2038_v20  ;;  %v2295_v20 = vpack.c.bf16 %v2257_v11, %v2256_v10  ;;  %v2240_v21 = vld [vmem:[#allocation10 + $0x110] sm:$0xff] }
 0xb6e   : > { %v2062_v19 = vpack.c.bf16 %v2002_v0, %v1998_v16  ;;  %2159 = vmatprep.subr.bf16.mxu1 %v2069_v28  ;;  %v2043_v16 = vld [vmem:[#allocation8 + $0x168] sm:$0xff]  ;;  %v2041_v0 = vld [vmem:[#allocation8 + $0x158] sm:$0xff] }
 0xb6f   : > { %v2083_v18 = vpack.c.bf16 %v2043_v16, %v2039_v13  ;;  %v2051_v28 = vld [vmem:[#allocation8 + $0x1a8] sm:$0xff] }
 0xb70   : > { %2117 = vmatpush1.bf16.msra.mxu0 %v2062_v19  ;;  %v2045_v19 = vld [vmem:[#allocation8 + $0x178] sm:$0xff] }
 0xb71   : > { %2160 = vmatpush1.bf16.msra.mxu1 %v2068_v36  ;;  %v2048_v36 = vld [vmem:[#allocation8 + $0x190] sm:$0xff] }
 0xb72   : > { %2161 = vmatprep.subr.bf16.mxu1 %v2073_v39  ;;  %v2059_v39 = vld [vmem:[#allocation8 + $0x1e8] sm:$0xff] }
 0xc3f   : > { %v1953_v1 = vpop.f32.mrb[48].mxu1 }
 0xc40   : > { %v1959_v3 = vadd.f32 %v1953_v1, %v1800_v52  ;;  %v2853_v4 = vpop.f32.mrb[49].mxu1  ;;  %v2072_v52 = vpack.c.bf16 %v2020_v50, %v2016_v47  ;;  %v2031_v1 = vld [vmem:[#allocation8 + $0x108] sm:$0xff]  ;;  %v2058_v47 = vld [vmem:[#allocation8 + $0x1e0] sm:$0xff] }
 0xc41   : > { %v1956_v5 = vpop.f32.mrb[50].mxu1  ;;  %v2090_v50 = vpack.c.bf16 %v2058_v47, %v2054_v46  ;;  %v2244_v46 = vld [vmem:[#allocation10 + $0x130] sm:$0xff]  ;;  %v2245_v47 = vld [vmem:[#allocation10 + $0x138] sm:$0xff] }
 0xc42   : > { %v1967_v6 = vadd.f32 %v2580_v2, %v1959_v3  ;;  %v2854_v7 = vpop.f32.mrb[51].mxu1  ;;  %2162 = vmatpush1.bf16.msra.mxu1 %v2072_v52  ;;  %v2035_v2 = vld [vmem:[#allocation8 + $0x128] sm:$0xff]  ;;  %v2033_v3 = vld [vmem:[#allocation8 + $0x118] sm:$0xff]  ;;  %v2060_v52 = vld [vmem:[#allocation8 + $0x1f0] sm:$0xff]  ;;  %v2289_v51 = vpack.c.bf16 %v2245_v47, %v2244_v46 }
 0xc43   : > { %2163 = vmatprep.subr.bf16.mxu1 %v2077_v59  ;;  %v2079_v4 = vpack.c.bf16 %v2035_v2, %v2031_v1  ;;  %v2037_v5 = vld [vmem:[#allocation8 + $0x138] sm:$0xff]  ;;  %v2034_v7 = vld [vmem:[#allocation8 + $0x120] sm:$0xff]  ;;  %v2582_v2 = vld [vmem:[%s3839_s6] ss:$0 sm:$0xff] }
 0xc44   : > { %v1968_v8 = vadd.f32 %v1967_v6, %v3538_v49  ;;  %v2067_v49 = vpack.c.bf16 %v2011_v24, %v2007_v22  ;;  %v2030_v6 = vld [vmem:[#allocation8 + $0x100] sm:$0xff]  ;;  %v2085_v22 = vpack.c.bf16 %v2045_v19, %v2041_v0  ;;  %v2040_v24 = vld [vmem:[#allocation8 + $0x150] sm:$0xff] }
 0xc45   : > { %v2078_v9 = vpack.c.bf16 %v2034_v7, %v2030_v6  ;;  %v2084_v26 = vpack.c.bf16 %v2044_v25, %v2040_v24  ;;  %v2238_v6 = vld [vmem:[#allocation10 + $0x100] sm:$0xff]  ;;  %v2239_v7 = vld [vmem:[#allocation10 + $0x108] sm:$0xff]  ;;  %v2208_v0 = vld [vmem:[#allocation10 + $0x10] sm:$0xff] }
 0xc46   : > { %1969 = vadd.xlane.f32.xlu1 %v1968_v8  ;;  %2118 = vmatprep.subr.bf16.mxu0 %v2067_v49  ;;  %v2047_v49 = vld [vmem:[#allocation8 + $0x188] sm:$0xff]  ;;  %v2286_v16 = vpack.c.bf16 %v2239_v7, %v2238_v6  ;;  %v2258_v25 = vld [vmem:[#allocation10 + $0x1a0] sm:$0xff]  ;;  %v2217_v7 = vld [vmem:[#allocation10 + $0x58] sm:$0xff] }
 0xc47   : > { %2119 = vmatpush1.bf16.msra.mxu0 %v2066_v32  ;;  %2164 = vmatpush1.bf16.msra.mxu1 %v2076_v63  ;;  %v2087_v30 = vpack.c.bf16 %v2051_v28, %v2047_v49  ;;  %v2046_v32 = vld [vmem:[#allocation8 + $0x180] sm:$0xff]  ;;  %v2581_v63 = vld [vmem:[%s3838_s5] ss:$0 sm:$0xff]  ;;  %v2227_v24 = vld [vmem:[#allocation10 + $0xa8] sm:$0xff] }
 0xc48   : > { %2120 = vmatprep.subr.bf16.mxu0 %v2071_v29  ;;  %v2086_v27 = vpack.c.bf16 %v2050_v33, %v2046_v32  ;;  %v2052_v29 = vld [vmem:[#allocation8 + $0x1b0] sm:$0xff]  ;;  %v2242_v33 = vld [vmem:[#allocation10 + $0x120] sm:$0xff] }
 0xc49   : > { %v2088_v38 = vpack.c.bf16 %v2052_v29, %v2048_v36  ;;  %v2229_v36 = vld [vmem:[#allocation10 + $0xb8] sm:$0xff]  ;;  %v2260_v29 = vld [vmem:[#allocation10 + $0x1b0] sm:$0xff] }
 0xc4b   : > { %2121 = vmatpush1.bf16.msra.mxu0 %v2070_v48  ;;  %v2056_v48 = vld [vmem:[#allocation8 + $0x1d0] sm:$0xff] }
 0xc4c   : > { %2122 = vmatprep.subr.bf16.mxu0 %v2075_v55  ;;  %v2092_v53 = vpack.c.bf16 %v2060_v52, %v2056_v48  ;;  %v2254_v55 = vld [vmem:[#allocation10 + $0x180] sm:$0xff] }
 0xc4d   : > { %v2294_v58 = vpack.c.bf16 %v2255_v57, %v2254_v55  ;;  %v2230_v48 = vld [vmem:[#allocation10 + $0xc0] sm:$0xff] }
 0xc4e   : > { %v2262_v52 = vld [vmem:[#allocation10 + $0x1c0] sm:$0xff] }
 0xc4f   : > { %2123 = vmatpush1.bf16.msra.mxu0 %v2074_v60  ;;  %v2214_v55 = vld [vmem:[#allocation10 + $0x40] sm:$0xff] }
 0xc50   : > { %2124 = vmatprep.subr.bf16.mxu0 %v2079_v4  ;;  %v2207_v4 = vld [vmem:[#allocation10 + $0x8] sm:$0xff] }
 0xc53   : > { %2125 = vmatpush1.bf16.msra.mxu0 %v2078_v9  ;;  %v2225_v9 = vld [vmem:[#allocation10 + $0x98] sm:$0xff] }
 0xc54   : > { %2126 = vmatprep.subr.bf16.mxu0 %v2083_v18  ;;  %v2209_v18 = vld [vmem:[#allocation10 + $0x18] sm:$0xff] }
 0xc55   : > { %v2271_v49 = vpack.c.bf16 %v2209_v18, %v2208_v0  ;;  %v2266_v0 = vld [vmem:[#allocation10 + $0x1e0] sm:$0xff] }
 0xc57   : > { %2127 = vmatpush1.bf16.msra.mxu0 %v2082_v23  ;;  %v2226_v23 = vld [vmem:[#allocation10 + $0xa0] sm:$0xff] }
 0xc58   : > { %2128 = vmatprep.subr.bf16.mxu0 %v2087_v30  ;;  %v2211_v30 = vld [vmem:[#allocation10 + $0x28] sm:$0xff]  ;;  %v2280_v31 = vpack.c.bf16 %v2227_v24, %v2226_v23  ;;  %v2250_v23 = vld [vmem:[#allocation10 + $0x160] sm:$0xff] }
 0xc59   : > { %v2251_v24 = vld [vmem:[#allocation10 + $0x168] sm:$0xff] }
 0xc5b   : > { %2129 = vmatpush1.bf16.msra.mxu0 %v2086_v27  ;;  %v2228_v27 = vld [vmem:[#allocation10 + $0xb0] sm:$0xff] }
 0xcd3   : > { %v1970_v40 = vpop.xlane.xlu1 %1969 }
 0xcd4   : > { %v1972_v41 = vmul.f32 0.0078125, %v1970_v40  ;;  %v2057_v40 = vld [vmem:[#allocation8 + $0x1d8] sm:$0xff] }
 0xcd6   : > { %v3748_v43 = vsub.f32 %v1968_v8, %v1972_v41  ;;  %v2081_v8 = vpack.c.bf16 %v2037_v5, %v2033_v3  ;;  %v2061_v41 = vld [vmem:[#allocation8 + $0x1f8] sm:$0xff]  ;;  %v2206_v3 = vld [vmem:[#allocation10] sm:$0xff] }
 0xcd7   : > { %v2093_v45 = vpack.c.bf16 %v2061_v41, %v2057_v40  ;;  %v2270_v13 = vpack.c.bf16 %v2207_v4, %v2206_v3  ;;  %v2212_v40 = vld [vmem:[#allocation10 + $0x30] sm:$0xff]  ;;  %v2213_v41 = vld [vmem:[#allocation10 + $0x38] sm:$0xff] }
 0xcd8   : > { %v1974_v44 = vmul.f32 %v3748_v43, %v3748_v43  ;;  %2165 = vmatprep.subr.bf16.mxu1 %v2081_v8  ;;  %v2224_v8 = vld [vmem:[#allocation10 + $0x90] sm:$0xff]  ;;  %v2273_v54 = vpack.c.bf16 %v2213_v41, %v2212_v40 }
 0xcd9   : > { %2166 = vmatpush1.bf16.msra.mxu1 %v2080_v12  ;;  %v2279_v19 = vpack.c.bf16 %v2225_v9, %v2224_v8  ;;  %v2216_v4 = vld [vmem:[#allocation10 + $0x50] sm:$0xff]  ;;  %v2249_v9 = vld [vmem:[#allocation10 + $0x158] sm:$0xff] }
 0xcda   : > { %1975 = vadd.xlane.f32.xlu1 %v1974_v44  ;;  %2167 = vmatprep.subr.bf16.mxu1 %v2085_v22  ;;  %v2091_v44 = vpack.c.bf16 %v2059_v39, %v2055_v37  ;;  %v2241_v22 = vld [vmem:[#allocation10 + $0x118] sm:$0xff]  ;;  %v2248_v8 = vld [vmem:[#allocation10 + $0x150] sm:$0xff]  ;;  %v2275_v10 = vpack.c.bf16 %v2217_v7, %v2216_v4 }
 0xcdb   : > { %v2287_v28 = vpack.c.bf16 %v2241_v22, %v2240_v21  ;;  %v2261_v37 = vld [vmem:[#allocation10 + $0x1b8] sm:$0xff]  ;;  %v2291_v11 = vpack.c.bf16 %v2249_v9, %v2248_v8 }
 0xcdc   : > { %2130 = vmatprep.subr.bf16.mxu0 %v2091_v44  ;;  %v2281_v44 = vpack.c.bf16 %v2229_v36, %v2228_v27  ;;  %v2252_v27 = vld [vmem:[#allocation10 + $0x170] sm:$0xff]  ;;  %v2253_v36 = vld [vmem:[#allocation10 + $0x178] sm:$0xff] }
 0xcdd   : > { %2168 = vmatpush1.bf16.msra.mxu1 %v2084_v26  ;;  %2131 = vmatpush1.bf16.msra.mxu0 %v2090_v50  ;;  %v2259_v26 = vld [vmem:[#allocation10 + $0x1a8] sm:$0xff] }
 0xcde   : > { %2169 = vmatprep.subr.bf16.mxu1 %v2089_v34  ;;  %2647 = vmatprep.subr.bf16.mxu0 %v2278_v56  ;;  %v2296_v32 = vpack.c.bf16 %v2259_v26, %v2258_v25  ;;  %v2243_v34 = vld [vmem:[#allocation10 + $0x128] sm:$0xff]  ;;  %v2292_v25 = vpack.c.bf16 %v2251_v24, %v2250_v23  ;;  %v2236_v26 = vld [vmem:[#allocation10 + $0xf0] sm:$0xff] }
 0xcdf   : > { %v2288_v39 = vpack.c.bf16 %v2243_v34, %v2242_v33  ;;  %v2231_v50 = vld [vmem:[#allocation10 + $0xc8] sm:$0xff]  ;;  %v2584_v23 = vld [vmem:[%s3876_s20] ss:$0 sm:$0xff]  ;;  %s3142_s20 = scalar_lea.vmem %s3141_s30, 256 }
 0xce0   : > { %v2215_v56 = vld [vmem:[#allocation10 + $0x48] sm:$0xff]  ;;  %v2282_v57 = vpack.c.bf16 %v2231_v50, %v2230_v48 }
 0xce1   : > { %2170 = vmatpush1.bf16.msra.mxu1 %v2088_v38  ;;  %v2272_v38 = vpack.c.bf16 %v2211_v30, %v2210_v42  ;;  %v2269_v30 = vld [vmem:[#allocation10 + $0x1f8] sm:$0xff] }
 0xce2   : > { %2171 = vmatprep.subr.bf16.mxu1 %v2093_v45  ;;  %v2297_v45 = vpack.c.bf16 %v2261_v37, %v2260_v29  ;;  %v2293_v29 = vpack.c.bf16 %v2253_v36, %v2252_v27  ;;  %v2094_v37 = vld [vmem:[%s3874_s13] sm:$0xf]  ;;  %s2432_s13 = sshll.u32 %s513_s12, 4  ;;  %s3791_s13 = int_to_ptr.vmem [resolvable:$true] %s2432_s13 }
 0xce3   : > { %v2107_v40 = vrot.slane %v2094_v37, %v601_v35  ;;  %v2103_v41 = vrot.slane %v2094_v37, %v597_v17  ;;  %s3136_s24 = scalar_lea.vmem %s3791_s13, 128  ;;  %p3143_p10 = scmp.lt.s32.totalorder %s3791_s13, %s3141_s30 }
 0xce4   : > { %p3137_p6 = scmp.ne.s32.totalorder %s3791_s13, %s3136_s24  ;;  %p3144_p1 = scmp.lt.s32.totalorder %s3142_s20, %s3136_s24 }
 0xce5   : > { %2172 = vmatpush1.bf16.msra.mxu1 %v2092_v53  ;;  %v2263_v53 = vld [vmem:[#allocation10 + $0x1c8] sm:$0xff] }
 0xce6   : > { %2669 = vmatprep.subr.bf16.mxu1 %v2294_v58  ;;  %v2298_v58 = vpack.c.bf16 %v2263_v53, %v2262_v52  ;;  %p3138_p2 = pnand %p3137_p6, %p3879_p0  ;;  %p3145_p11 = por %p3144_p1, %p3143_p10 }
 0xce8   : > { %p3139_p5 = pneg %p3138_p2 }
 0xcea   : > { %p3146_p12 = pnand %p3145_p11, %p3139_p5 }
 0xd67   : > { %v1976_v59 = vpop.xlane.xlu1 %1975 }
 0xd68   : > { %v1977_v60 = vmul.f32 0.0078125, %v1976_v59  ;;  %v2246_v59 = vld [vmem:[#allocation10 + $0x140] sm:$0xff] }
 0xd6a   : > { %v1978_v61 = vadd.f32 1e-05, %v1977_v60  ;;  %v2247_v60 = vld [vmem:[#allocation10 + $0x148] sm:$0xff] }
 0xd6b   : > { %v2290_v3 = vpack.c.bf16 %v2247_v60, %v2246_v59 }
 0xd6c   : > { %2990 = vrsqrt.f32 %v1978_v61  ;;  %v2232_v61 = vld [vmem:[#allocation10 + $0xd0] sm:$0xff] }
 0xd76   : > { %v2991_v62 = vpop.eup %2990 }
 0xd77   : > { %v1980_v1 = vmul.f32 %v2991_v62, %v3748_v43  ;;  %v2233_v62 = vld [vmem:[#allocation10 + $0xd8] sm:$0xff] }
 0xd79   : > { %v1988_v5 = vmul.f32 %v2581_v63, %v1980_v1  ;;  %v2264_v63 = vld [vmem:[#allocation10 + $0x1d0] sm:$0xff]  ;;  %v2265_v1 = vld [vmem:[#allocation10 + $0x1d8] sm:$0xff] }
 0xd7a   : > { %v2299_v6 = vpack.c.bf16 %v2265_v1, %v2264_v63  ;;  %v2583_v1 = vld [vmem:[%s3875_s19] ss:$0 sm:$0xff]  ;;  %s3878_s19 = sld [smem:[#allocation22_spill]] }
 0xd7b   : > { %v3759_v12 = vadd.f32 %v2582_v2, %v1988_v5  ;;  %v2274_v2 = vpack.c.bf16 %v2215_v56, %v2214_v55  ;;  %v2283_v5 = vpack.c.bf16 %v2233_v62, %v2232_v61 }
 0xd7d   : > { %v1997_v43 = vpack.c.bf16 %v3759_v12, %v3759_v12 }
 0xd7f   : > { %2149 = vmatmul.mubr.bf16.vlgmr.msra.gmra.mrb[52].mxu0 %v1997_v43  ;;  %2190 = vmatmul.mubr.bf16.vlgmr.msra.gmra.mrb[52].mxu1 %v1997_v43  ;;  %v2267_v43 = vld [vmem:[#allocation10 + $0x1e8] sm:$0xff] }
 0xd80   : > { %2648 = vmatpush3.bf16.msra.mxu0 %v2270_v13  ;;  %2670 = vmatpush3.bf16.msra.mxu1 %v2286_v16  ;;  %v2234_v13 = vld [vmem:[#allocation10 + $0xe0] sm:$0xff]  ;;  %v2235_v16 = vld [vmem:[#allocation10 + $0xe8] sm:$0xff]  ;;  %v2300_v21 = vpack.c.bf16 %v2267_v43, %v2266_v0  ;;  %s3789_s0 = scalar_lea.hbm %s3878_s19, %s2587_s16 }
 0xd81   : > { %2649 = vmatprep.subr.bf16.mxu0 %v2279_v19  ;;  %2671 = vmatprep.subr.bf16.mxu1 %v2295_v20  ;;  %v2284_v18 = vpack.c.bf16 %v2235_v16, %v2234_v13  ;;  %v2218_v19 = vld [vmem:[#allocation10 + $0x60] sm:$0xff]  ;;  %v2219_v20 = vld [vmem:[#allocation10 + $0x68] sm:$0xff] }
 0xd82   : > { %v2276_v22 = vpack.c.bf16 %v2219_v20, %v2218_v19 }
 0xd84   : > { %2650 = vmatpush3.bf16.msra.mxu0 %v2271_v49  ;;  %2672 = vmatpush3.bf16.msra.mxu1 %v2287_v28  ;;  %v2237_v49 = vld [vmem:[#allocation10 + $0xf8] sm:$0xff]  ;;  %v2268_v28 = vld [vmem:[#allocation10 + $0x1f0] sm:$0xff] }
 0xd85   : > { %2651 = vmatprep.subr.bf16.mxu0 %v2280_v31  ;;  %2673 = vmatprep.subr.bf16.mxu1 %v2296_v32  ;;  %v2285_v42 = vpack.c.bf16 %v2237_v49, %v2236_v26  ;;  %v2220_v31 = vld [vmem:[#allocation10 + $0x70] sm:$0xff]  ;;  %v2221_v32 = vld [vmem:[#allocation10 + $0x78] sm:$0xff]  ;;  %v2301_v33 = vpack.c.bf16 %v2269_v30, %v2268_v28 }
 0xd86   : > { %v2277_v34 = vpack.c.bf16 %v2221_v32, %v2220_v31 }
 0xd88   : > { %2652 = vmatpush3.bf16.msra.mxu0 %v2272_v38  ;;  %2674 = vmatpush3.bf16.msra.mxu1 %v2288_v39  ;;  %v2110_v38 = vsub.s32 3, %v3558_v14  ;;  %v2099_v39 = vrot.slane %v2094_v37, %v593_v15 }
 0xd89   : > { %2653 = vmatprep.subr.bf16.mxu0 %v2281_v44  ;;  %2675 = vmatprep.subr.bf16.mxu1 %v2297_v45 }
 0xd8a   : > { %v2111_v44 = vrot.slane %v2094_v37, %v2110_v38 }
 0xd8c   : > { %2654 = vmatpush3.bf16.msra.mxu0 %v2273_v54  ;;  %2676 = vmatpush3.bf16.msra.mxu1 %v2289_v51 }
 0xd8d   : > { %2655 = vmatprep.subr.bf16.mxu0 %v2282_v57  ;;  %2677 = vmatprep.subr.bf16.mxu1 %v2298_v58 }
 0xd90   : > { %2656 = vmatpush3.bf16.msra.mxu0 %v2274_v2  ;;  %2678 = vmatpush3.bf16.msra.mxu1 %v2290_v3 }
 0xd91   : > { %2657 = vmatprep.subr.bf16.mxu0 %v2283_v5  ;;  %2679 = vmatprep.subr.bf16.mxu1 %v2299_v6 }
 0xd94   : > { %2658 = vmatpush3.bf16.msra.mxu0 %v2275_v10  ;;  %2680 = vmatpush3.bf16.msra.mxu1 %v2291_v11 }
 0xd95   : > { %2659 = vmatprep.subr.bf16.mxu0 %v2284_v18  ;;  %2681 = vmatprep.subr.bf16.mxu1 %v2300_v21 }
 0xd98   : > { %2660 = vmatpush3.bf16.msra.mxu0 %v2276_v22  ;;  %2682 = vmatpush3.bf16.msra.mxu1 %v2292_v25 }
 0xd99   : > { %2661 = vmatprep.subr.bf16.mxu0 %v2285_v42  ;;  %2683 = vmatprep.subr.bf16.mxu1 %v2301_v33 }
 0xd9c   : > { %2662 = vmatpush3.bf16.msra.mxu0 %v2277_v34  ;;  %2684 = vmatpush3.bf16.msra.mxu1 %v2293_v29 }
 0xe52   : > { %v2150_v45 = vpop.f32.mrb[52].mxu0  ;;  %v2191_v46 = vpop.f32.mrb[52].mxu1 }
 0xe53   : > { %v2151_v47 = vadd.f32 %v2150_v45, %v2099_v39  ;;  %v2192_v48 = vadd.f32 %v2191_v46, %v2107_v40  ;;  %v2152_v50 = vpop.f32.mrb[53].mxu0  ;;  %v2193_v52 = vpop.f32.mrb[53].mxu1 }
 0xe54   : > { %v2153_v53 = vadd.f32 %v2152_v50, %v2103_v41  ;;  %v2194_v54 = vadd.f32 %v2193_v52, %v2111_v44  ;;  %v2154_v51 = vpop.f32.mrb[54].mxu0  ;;  %v2195_v55 = vpop.f32.mrb[54].mxu1 }
 0xe55   : > { %v2198_v56 = vmax.f32 %v2151_v47, 0.0  ;;  %v2200_v57 = vmax.f32 %v2192_v48, 0.0  ;;  %v2155_v15 = vpop.f32.mrb[55].mxu0  ;;  %v2196_v58 = vpop.f32.mrb[55].mxu1 }
 0xe56   : > { %v2199_v59 = vmax.f32 %v2153_v53, 0.0  ;;  %v2201_v35 = vmax.f32 %v2194_v54, 0.0 }
 0xe57   : > { %v2202_v17 = vpack.c.bf16 %v2198_v56, %v2198_v56  ;;  %v2204_v61 = vpack.c.bf16 %v2200_v57, %v2200_v57 }
 0xe58   : > { %v2203_v60 = vpack.c.bf16 %v2199_v59, %v2199_v59  ;;  %v2205_v14 = vpack.c.bf16 %v2201_v35, %v2201_v35 }
 0xe5a   : > { %2341 = vmatprep.mubr.bf16.mxu0 %v2203_v60  ;;  %2381 = vmatprep.mubr.bf16.mxu1 %v2205_v14 }
 0xe5b   : > { %2342 = vmatmul.mubr.bf16.vlgmr.msra.gmra.mrb[56].mxu0 %v2202_v17  ;;  %2382 = vmatmul.mubr.bf16.vlgmr.msra.gmra.mrb[56].mxu1 %v2204_v61 }
 0xf2e   : > { %v2663_v62 = vpop.f32.mrb[56].mxu0  ;;  %v2685_v63 = vpop.f32.mrb[56].mxu1 }
 0xf2f   : > { %v2664_v2 = vpop.f32.mrb[57].mxu0  ;;  %v2686_v3 = vpop.f32.mrb[57].mxu1 }
 0xf30   : > { %v2665_v4 = vadd.f32 %v2664_v2, %v2663_v62  ;;  %v2687_v5 = vadd.f32 %v2686_v3, %v2685_v63  ;;  %v2666_v6 = vpop.f32.mrb[58].mxu0  ;;  %v2688_v7 = vpop.f32.mrb[58].mxu1 }
 0xf31   : > { %v2667_v8 = vpop.f32.mrb[59].mxu0  ;;  %v2689_v9 = vpop.f32.mrb[59].mxu1 }
 0xf32   : > { %v2344_v10 = vadd.f32 %v2665_v4, %v2583_v1 }
 0xf34   : > { %v2384_v11 = vadd.f32 %v2687_v5, %v2344_v10 }
 0xf36   : > { %v2389_v13 = vadd.f32 %v2384_v11, %v3759_v12  ;;  %v2585_v12 = vld [vmem:[%s3877_s8] ss:$0 sm:$0xff] }
 0xf38   : > { %2390 = vadd.xlane.f32.xlu1 %v2389_v13 }
 0xfc5   : > { %v2391_v16 = vpop.xlane.xlu1 %2390 }
 0xfc6   : > { %v2392_v0 = vmul.f32 0.0078125, %v2391_v16 }
 0xfc8   : > { %v2393_v18 = vsub.f32 %v2389_v13, %v2392_v0 }
 0xfca   : > { %v2394_v43 = vmul.f32 %v2393_v18, %v2393_v18 }
 0xfcc   : > { %2395 = vadd.xlane.f32.xlu0 %v2394_v43 }
0x1059   : > { %v2396_v19 = vpop.xlane.xlu0 %2395 }
0x105a   : > { %v2397_v20 = vmul.f32 0.0078125, %v2396_v19 }
0x105c   : > { %v2398_v21 = vadd.f32 1e-05, %v2397_v20 }
0x105e   : > { %2992 = vrsqrt.f32 %v2398_v21 }
0x1068   : > { %v2993_v22 = vpop.eup %2992 }
0x1069   : > { %v2400_v24 = vmul.f32 %v2993_v22, %v2393_v18 }
0x106b   : > { %v2408_v25 = vmul.f32 %v2584_v23, %v2400_v24 }
0x106d   : > { %v2416_v26 = vadd.f32 %v2585_v12, %v2408_v25 }
0x106f   : > { %2417 = vst [vmem:[%s513_s12] sm:$0xff] %v2416_v26 }
0x1070   : > { %3149 = shalt.err (!%p3146_p12)
}
0x1071   : > { %s3150_s1 = scalar_lea.hbm %s3789_s0, 128  ;;  %s3154_s8 = scalar_lea.hbm %s3878_s19, 256 }
0x1072   : > { %p3151_p13 = scmp.ne.s32.totalorder %s3789_s0, %s3150_s1  ;;  %p3155_p9 = scmp.lt.u32.totalorder %s3789_s0, %s3878_s19 }
0x1073   : > { %p3156_p4 = scmp.lt.u32.totalorder %s3154_s8, %s3150_s1  ;;  %p3158_p6 = scmp.lt.u32.totalorder %s3150_s1, %s3789_s0 }
0x1074   : > { %p3152_p3 = pnand %p3151_p13, %p3879_p0 }
0x1075   : > { %p3157_p8 = por %p3156_p4, %p3155_p9 }
0x1076   : > { %p3153_p7 = pneg %p3152_p3 }
0x1077   : > { %p3159_p2 = por %p3158_p6, %p3157_p8 }
0x1079   : > { %p3160_p5 = pnand %p3159_p2, %p3153_p7 }
0x107b   : > { %3163 = shalt.err (!%p3160_p5)
}
0x107c   : > { %2873 = dma.vmem_to_hbm [thread:$0]  (%p3879_p0), %s3791_s13, 128, %s3789_s0, %s2419_s21  }
0x107d PF: > { %s2444_s10 = sand.u32 1, %s3198_s25   ;;  %p3880_p10 = scmp.ne.s32.totalorder %s3866_s29, 0 }
0x107e   : > { %p3881_p1 = scmp.ge.s32.totalorder %s3210_s28, 2  ;;  %s2445_s11 = scalar_lea.sflag [#allocation4], %s2444_s10 }
0x1080   : > { %p2893_p11 = pnand %p3881_p1, %p3880_p10 }
0x1082   : > { %3193 = dma.done.wait (!%p2893_p11), %s2445_s11, 128  }
0x1083   : > { %3195 = vsyncadd (!%p2893_p11), %s2445_s11, 4294967168  ;;  %p28_p12 = scmp.ge.s32.totalorder %s3440_s18, 4   ;;  %s3882_s25 = smov %s3202_s26 }
0x1084   : > { %s3883_s26 = smov %s3206_s27  ;;  %s3884_s27 = smov %s3451_s23 }
0x1085   : > { %s3885_s28 = smov %s3440_s18  ;;  %30 = sbr.rel (!%p28_p12) target bundleno = 15 (0xf), region = 140 }
0x108c   :  { %2450 = vsyncpa [#allocation3], 1 }
0x108d   :  { %2452 = vsyncpa [#allocation3 + $0x1], 1 }
0x108e   :  { %2453 = vsyncpa [#allocation6], 1 }
0x108f   :  { %2454 = vsyncpa [#allocation9], 1 }
0x1090   :  { %2455 = vsyncpa [#allocation4], 1 }
0x1091   :  { %2457 = vsyncpa [#allocation4 + $0x1], 1 }

</bundles_post_ra>
